<compile_context>
chip_gen: v7x
topology: tpu7x:2x2x1
jax: 0.10.0
libtpu: 0.0.40
codegen_flags: <defaults>
</compile_context>

<pallas_src>
import functools
import math

import jax
import jax.numpy as jnp
from jax.experimental import pallas as pl
from jax.experimental.pallas import tpu as pltpu


_PARAM_ORDER = ("wq", "bq", "wk", "bk", "wv", "bv",
                "wattn", "battn", "ln1g", "ln1b",
                "wi", "bi", "wout", "bout", "ln2g", "ln2b")
_MATMUL_WEIGHTS = {"wq", "wk", "wv", "wattn", "wi", "wout"}


# ----------------------------------------------------------------------------
# Hardware-derived budgets / dtype decisions.
# ----------------------------------------------------------------------------
def _vmem_capacity_bytes():
    try:
        return int(pltpu.get_tpu_info().vmem_capacity_bytes)
    except Exception:
        return 64 << 20        # conservative fallback (v7x per-TensorCore VMEM)


def _supports_bf16_transcendentals():
    # bf16 VPU/EUP exists on v6e and later; keep f32 elementwise on v2-v5.
    try:
        kind = jax.devices()[0].device_kind.lower()
    except Exception:
        return False
    return not any(tag in kind for tag in ("v2", "v3", "v4", "v5"))


def _layer_param_bytes(params):
    total = 0
    for name in _PARAM_ORDER:
        p = params[name]
        itemsize = 2 if name in _MATMUL_WEIGHTS else p.dtype.itemsize
        total += int(p.size) * itemsize
    return total


def _estimate_vmem_bytes(S, H, I, nH, dh, tq, param_bytes, act_bytes):
    f32, bf16 = 4, 2
    s_pad = -(-S // 16) * 16                  # bf16 sublane padding
    dh_pad = -(-dh // 128) * 128              # lane padding of the head dim
    # double-buffered streamed blocks (inputs + output)
    blocks = 2 * (S * H * f32                 # full hidden slab (K/V pass)
                  + tq * H * f32              # residual / Q tile
                  + nH * tq * S * bf16        # rel-pos bias (+mask) tile
                  + tq * H * f32)             # output tile
    weights = param_bytes                     # single-buffered (grid-invariant)
    scratch = 2 * nH * s_pad * dh_pad * bf16  # persistent head-major K/V caches
    temps = (nH * tq * S * f32                # attention scores
             + nH * tq * S * act_bytes        # softmax numerator
             + nH * tq * H * f32              # per-head self-output partials
             + tq * I * (f32 + act_bytes)     # FFN intermediate
             + 2 * S * H * f32                # K/V projection temporaries (qi == 0)
             + 8 * tq * H * f32)              # LN / residual temporaries
    return blocks + weights + scratch + temps + (4 << 20)


def _choose_tq(S, H, I, nH, dh, param_bytes, act_bytes, budget):
    """Largest query tile whose estimated footprint fits the VMEM budget."""
    if S <= 128:
        return S
    for tq in (256, 128, 64, 32, 16, 8):
        if S % tq == 0 and _estimate_vmem_bytes(S, H, I, nH, dh, tq,
                                                param_bytes, act_bytes) <= budget:
            return tq
    for tq in (8, 16, 32, 64, 128, 256):
        if S % tq == 0:
            return tq
    return S


def _vmem_limit_bytes(estimate, budget):
    return int(min(max(estimate, 32 << 20), max(budget, 32 << 20)))


# ----------------------------------------------------------------------------
# Pallas kernel: one LayoutLMv3Layer, one (batch, query-tile) grid step.
# ----------------------------------------------------------------------------
def _layer_kernel(hs_full_ref, hs_tile_ref, bias_ref,
                  wq_ref, bq_ref, wk_ref, bk_ref, wv_ref, bv_ref,
                  wattn_ref, battn_ref, ln1g_ref, ln1b_ref,
                  wi_ref, bi_ref, wout_ref, bout_ref, ln2g_ref, ln2b_ref,
                  out_ref,
                  k_scr, v_scr,
                  *, num_heads, head_dim, eps, act_dtype):
    qi = pl.program_id(1)
    nH, dh = num_heads, head_dim
    inv_sqrt_dh = 1.0 / math.sqrt(dh)

    # --- K/V for the full sequence: computed once per batch element ----------
    @pl.when(qi == 0)
    def _():
        hs_full = hs_full_ref[0].astype(jnp.bfloat16)                  # (S, H)
        k = jnp.dot(hs_full, wk_ref[...],
                    preferred_element_type=jnp.float32) + bk_ref[...]
        v = jnp.dot(hs_full, wv_ref[...],
                    preferred_element_type=jnp.float32) + bv_ref[...]
        k = k.astype(jnp.bfloat16)
        v = v.astype(jnp.bfloat16)
        for h in range(nH):                    # static lane slices -> head-major cache
            lo = h * dh
            k_scr[h] = k[:, lo:lo + dh]                                # (S, dh)
            v_scr[h] = v[:, lo:lo + dh]

    # --- Q projection for this query tile (lane-dense pipelined tile) --------
    hs_q = hs_tile_ref[0]                                              # (TQ, H) f32 residual
    q = jnp.dot(hs_q.astype(jnp.bfloat16), wq_ref[...],
                preferred_element_type=jnp.float32) + bq_ref[...]
    q = (q * inv_sqrt_dh).astype(jnp.bfloat16)
    q3 = jnp.stack([q[:, h * dh:(h + 1) * dh] for h in range(nH)], axis=0)  # (nH,TQ,dh)

    # --- head-batched attention ----------------------------------------------
    k3 = k_scr[...]                                                    # (nH, S, dh) bf16
    v3 = v_scr[...]
    scores = jax.lax.dot_general(                                      # q . k^T, no transpose
        q3, k3, dimension_numbers=(((2,), (2,)), ((0,), (0,))),
        preferred_element_type=jnp.float32)                            # (nH, TQ, S)
    # rel-pos bias already carries the additive attention mask (folded host-side)
    scores = scores + bias_ref[0].astype(jnp.float32)
    # cogview / PB-Relax softmax == standard max-stabilized softmax (folded /32, x32)
    mx = jnp.max(scores, axis=-1, keepdims=True)
    p = jnp.exp((scores - mx).astype(act_dtype))       # bf16 EUP/VPU on v6e/v7x, f32 on v5e
    denom = jnp.sum(p.astype(jnp.float32), axis=-1, keepdims=True)
    ctx3 = jax.lax.dot_general(
        p.astype(jnp.bfloat16), v3,
        dimension_numbers=(((2,), (1,)), ((0,), (0,))),
        preferred_element_type=jnp.float32)                            # (nH, TQ, dh)
    # normalize after PV: dh-wide instead of S-wide pass; EUP approx reciprocal
    ctx3 = ctx3 * pl.reciprocal(denom, approx=True)

    # --- self output: head-batched MXU matmul + head-sum, residual, LN -------
    attn = jax.lax.dot_general(                                        # (nH, TQ, H) partials
        ctx3.astype(jnp.bfloat16), wattn_ref[...],
        dimension_numbers=(((2,), (1,)), ((0,), (0,))),
        preferred_element_type=jnp.float32)
    x = jnp.sum(attn, axis=0) + battn_ref[...] + hs_q                  # (TQ, H)
    mean = jnp.mean(x, axis=-1, keepdims=True)
    var = jnp.mean((x - mean) ** 2, axis=-1, keepdims=True)
    x = (x - mean) * jax.lax.rsqrt(var + eps) * ln1g_ref[...] + ln1b_ref[...]

    # --- intermediate (exact GELU) + output: dense + residual + LN -----------
    inter = jnp.dot(x.astype(jnp.bfloat16), wi_ref[...],
                    preferred_element_type=jnp.float32) + bi_ref[...]
    # erf kept in f32 (EUP); the surrounding elementwise chain runs in act_dtype
    # (bf16 on v6e/v7x halves VPU traffic and the temp footprint).
    g = jax.lax.erf(inter * (1.0 / math.sqrt(2.0))).astype(act_dtype)
    inter = (0.5 * inter.astype(act_dtype)) * (1.0 + g)
    ffn = jnp.dot(inter.astype(jnp.bfloat16), wout_ref[...],
                  preferred_element_type=jnp.float32) + bout_ref[...]
    y = ffn + x
    mean2 = jnp.mean(y, axis=-1, keepdims=True)
    var2 = jnp.mean((y - mean2) ** 2, axis=-1, keepdims=True)
    y = (y - mean2) * jax.lax.rsqrt(var2 + eps) * ln2g_ref[...] + ln2b_ref[...]

    out_ref[0] = y.astype(out_ref.dtype)


def run_layer(hidden, bias_bf16, params, *, num_heads, head_dim, eps, tq,
              act_dtype, vmem_limit):
    B, S, H = hidden.shape
    nH = num_heads
    assert S % tq == 0
    n_q = S // tq

    flat = []
    for name in _PARAM_ORDER:
        p = params[name]
        if name in _MATMUL_WEIGHTS:
            p = p.astype(jnp.bfloat16)          # bf16 MXU operands, f32 accumulation
        if name == "wattn":
            p = p.reshape(nH, head_dim, H)      # head-major for batched recombination
        flat.append(p)

    kernel = functools.partial(_layer_kernel, num_heads=nH, head_dim=head_dim,
                               eps=eps, act_dtype=act_dtype)

    in_specs = [
        pl.BlockSpec((1, S, H), lambda b, qi: (b, 0, 0)),            # full slab (K/V @ qi==0)
        pl.BlockSpec((1, tq, H), lambda b, qi: (b, qi, 0)),          # lane-dense residual/Q tile
        pl.BlockSpec((1, nH, tq, S), lambda b, qi: (b, 0, qi, 0)),   # bf16 bias(+mask) tile
    ]
    # Grid-invariant parameters: single-buffered (constant index map), halving
    # their VMEM footprint vs the default double-buffered pipeline.
    for p in flat:
        in_specs.append(pl.BlockSpec(p.shape,
                                     lambda b, qi, nd=p.ndim: (0,) * nd,
                                     pipeline_mode=pl.Buffered(1)))

    out_spec = pl.BlockSpec((1, tq, H), lambda b, qi: (b, qi, 0))

    scratch = [
        pltpu.VMEM((nH, S, head_dim), jnp.bfloat16),    # K cache, head-major
        pltpu.VMEM((nH, S, head_dim), jnp.bfloat16),    # V cache, head-major
    ]

    return pl.pallas_call(
        kernel,
        out_shape=jax.ShapeDtypeStruct((B, S, H), hidden.dtype),
        grid=(B, n_q),
        in_specs=in_specs,
        out_specs=out_spec,
        scratch_shapes=scratch,
        # NOTE: the qi axis carries the per-batch K/V scratch, so it must stay
        # "arbitrary" (sequential); only the batch axis shards across cores.
        compiler_params=pltpu.CompilerParams(
            dimension_semantics=("parallel", "arbitrary"),
            vmem_limit_bytes=vmem_limit),
    )(hidden, hidden, bias_bf16, *flat)


# ----------------------------------------------------------------------------
# Relative-position bias glue (integer bucketing + gather) — plain JAX.
# ----------------------------------------------------------------------------
def relative_position_bucket(relative_position, num_buckets, max_distance):
    num_buckets = num_buckets // 2
    ret = (relative_position > 0).astype(jnp.int32) * num_buckets
    n = jnp.abs(relative_position)
    max_exact = num_buckets // 2
    is_small = n < max_exact
    n_safe = jnp.maximum(n, 1)                  # avoid log(0) in the unselected branch
    val_if_large = max_exact + (
        jnp.log(n_safe.astype(jnp.float32) / max_exact)
        / math.log(max_distance / max_exact)
        * (num_buckets - max_exact)
    ).astype(jnp.int32)
    val_if_large = jnp.minimum(val_if_large, num_buckets - 1)
    ret = ret + jnp.where(is_small, n, val_if_large)
    return ret


def cal_1d_pos_emb(position_ids, rel_pos_bias_wt, rel_pos_bins, max_rel_pos):
    rel_pos_mat = position_ids[:, None, :] - position_ids[:, :, None]
    buckets = relative_position_bucket(rel_pos_mat, rel_pos_bins, max_rel_pos)
    emb = rel_pos_bias_wt[buckets]              # (B, S, S, nH)
    return jnp.transpose(emb, (0, 3, 1, 2))     # (B, nH, S, S)


def cal_2d_pos_emb(bbox, wx_t, wy_t, rel_2d_pos_bins, max_rel_2d_pos):
    px = bbox[:, :, 0]
    py = bbox[:, :, 3]
    rel_x = px[:, None, :] - px[:, :, None]
    rel_y = py[:, None, :] - py[:, :, None]
    bx = relative_position_bucket(rel_x, rel_2d_pos_bins, max_rel_2d_pos)
    by = relative_position_bucket(rel_y, rel_2d_pos_bins, max_rel_2d_pos)
    ex = jnp.transpose(wx_t[bx], (0, 3, 1, 2))
    ey = jnp.transpose(wy_t[by], (0, 3, 1, 2))
    return ex + ey


def build_rel_bias(attention_mask, position_ids, bbox, enc_params, *, num_heads,
                   head_dim, rel_pos_bins, max_rel_pos,
                   rel_2d_pos_bins, max_rel_2d_pos):
    """bf16 (B, nH, S, S) == (rel_pos + rel_2d)/sqrt(dh) + (1-mask)*-1e4 (folded)."""
    B, S = position_ids.shape
    rel_pos = cal_1d_pos_emb(position_ids, enc_params["rel_pos_bias_wt"],
                             rel_pos_bins, max_rel_pos)
    rel_2d = cal_2d_pos_emb(bbox, enc_params["rel_pos_x_bias_wt"],
                            enc_params["rel_pos_y_bias_wt"],
                            rel_2d_pos_bins, max_rel_2d_pos)
    bias = (rel_pos + rel_2d) / math.sqrt(head_dim)
    mask_add = ((1.0 - attention_mask) * -10000.0).astype(jnp.float32)
    bias = bias + mask_add[:, None, None, :]       # fold additive mask over keys
    # TODO(synk): for large B*S, stream packed int32 bucket indices + the small
    # (buckets, nH) tables instead of this bf16 (B,nH,S,S) slab (~6x less HBM).
    return jnp.broadcast_to(bias.astype(jnp.bfloat16), (B, num_heads, S, S))


# ----------------------------------------------------------------------------
# Encoder forward (eval mode: dropout = identity, no head_mask).
# ----------------------------------------------------------------------------
def layoutlmv3_encoder(hidden, bbox, attention_mask, position_ids, enc_params,
                       layer_params, *, num_heads, head_dim, eps,
                       rel_pos_bins, max_rel_pos,
                       rel_2d_pos_bins, max_rel_2d_pos):
    B, S, H = hidden.shape
    bias = build_rel_bias(attention_mask, position_ids, bbox, enc_params,
                          num_heads=num_heads, head_dim=head_dim,
                          rel_pos_bins=rel_pos_bins, max_rel_pos=max_rel_pos,
                          rel_2d_pos_bins=rel_2d_pos_bins,
                          max_rel_2d_pos=max_rel_2d_pos)

    vmem_budget = (_vmem_capacity_bytes() * 4) // 5      # ~80% of physical VMEM
    act_dtype = jnp.bfloat16 if _supports_bf16_transcendentals() else jnp.float32
    act_bytes = jnp.dtype(act_dtype).itemsize
    I = layer_params[0]["wi"].shape[1]
    pbytes = _layer_param_bytes(layer_params[0])
    tq = _choose_tq(S, H, I, num_heads, head_dim, pbytes, act_bytes, vmem_budget)
    vmem_limit = _vmem_limit_bytes(
        _estimate_vmem_bytes(S, H, I, num_heads, head_dim, tq, pbytes, act_bytes),
        vmem_budget)

    for params in layer_params:
        hidden = run_layer(hidden, bias, params, num_heads=num_heads,
                           head_dim=head_dim, eps=eps, tq=tq,
                           act_dtype=act_dtype, vmem_limit=vmem_limit)
    return hidden


# ----------------------------------------------------------------------------
# Pure-JAX reference mirroring the kernel's dtype decisions (sanity check).
# ----------------------------------------------------------------------------
def _layer_ref(hs, bias_bf16, p, num_heads, head_dim, eps, act_dtype):
    B, S, H = hs.shape
    bf = jnp.bfloat16

    def dense(x, w, b):
        return jnp.dot(x.astype(bf), w.astype(bf),
                       preferred_element_type=jnp.float32) + b

    q = (dense(hs, p["wq"], p["bq"][0]) / math.sqrt(head_dim)).astype(bf)
    k = dense(hs, p["wk"], p["bk"][0]).astype(bf)
    v = dense(hs, p["wv"], p["bv"][0]).astype(bf)

    def split(x):
        return jnp.transpose(x.reshape(B, S, num_heads, head_dim), (0, 2, 1, 3))

    q, k, v = split(q), split(k), split(v)
    scores = jnp.einsum("bhqd,bhkd->bhqk", q, k,
                        preferred_element_type=jnp.float32)
    scores = scores + bias_bf16.astype(jnp.float32)      # mask already folded in
    mx = jnp.max(scores, axis=-1, keepdims=True)         # == PB-Relax softmax
    pr = jnp.exp((scores - mx).astype(act_dtype))
    denom = jnp.sum(pr.astype(jnp.float32), axis=-1, keepdims=True)
    ctx = jnp.einsum("bhqk,bhkd->bhqd", pr.astype(bf), v,
                     preferred_element_type=jnp.float32) / denom
    ctx = jnp.transpose(ctx, (0, 2, 1, 3)).reshape(B, S, H)

    x = dense(ctx, p["wattn"], p["battn"][0]) + hs
    m = x.mean(-1, keepdims=True)
    vr = ((x - m) ** 2).mean(-1, keepdims=True)
    x = (x - m) * jax.lax.rsqrt(vr + eps) * p["ln1g"][0] + p["ln1b"][0]

    i = dense(x, p["wi"], p["bi"][0])
    g = jax.lax.erf(i * (1.0 / math.sqrt(2.0))).astype(act_dtype)
    i = (0.5 * i.astype(act_dtype)) * (1.0 + g)
    y = dense(i, p["wout"], p["bout"][0]) + x
    m = y.mean(-1, keepdims=True)
    vr = ((y - m) ** 2).mean(-1, keepdims=True)
    return (y - m) * jax.lax.rsqrt(vr + eps) * p["ln2g"][0] + p["ln2b"][0]


if __name__ == "__main__":
    # small config, consistent with LayoutLMv3 structure
    B, S, H, nH, I, L = 2, 8, 32, 4, 64, 2
    head_dim = H // nH
    eps = 1e-5
    rel_pos_bins, max_rel_pos = 32, 128
    rel_2d_pos_bins, max_rel_2d_pos = 64, 256

    key = jax.random.PRNGKey(0)
    keys = jax.random.split(key, 128)
    _ki = iter(keys)

    def init(shape, scale=0.02):
        return jax.random.normal(next(_ki), shape, jnp.float32) * scale

    hidden = jax.random.normal(next(_ki), (B, S, H), jnp.float32)
    position_ids = jnp.broadcast_to(jnp.arange(S, dtype=jnp.int32), (B, S))
    bbox = jax.random.randint(next(_ki), (B, S, 4), 0, 100, dtype=jnp.int32)
    attention_mask = jnp.ones((B, S), jnp.float32)

    enc_params = {
        "rel_pos_bias_wt": init((rel_pos_bins, nH)),       # weight.t()
        "rel_pos_x_bias_wt": init((rel_2d_pos_bins, nH)),
        "rel_pos_y_bias_wt": init((rel_2d_pos_bins, nH)),
    }
    layer_params = []
    for _ in range(L):
        layer_params.append({
            "wq": init((H, H)), "bq": init((1, H)),
            "wk": init((H, H)), "bk": init((1, H)),
            "wv": init((H, H)), "bv": init((1, H)),
            "wattn": init((H, H)), "battn": init((1, H)),
            "ln1g": jnp.ones((1, H), jnp.float32),
            "ln1b": jnp.zeros((1, H), jnp.float32),
            "wi": init((H, I)), "bi": init((1, I)),
            "wout": init((I, H)), "bout": init((1, H)),
            "ln2g": jnp.ones((1, H), jnp.float32),
            "ln2b": jnp.zeros((1, H), jnp.float32),
        })

    out = layoutlmv3_encoder(
        hidden, bbox, attention_mask, position_ids, enc_params, layer_params,
        num_heads=nH, head_dim=head_dim, eps=eps,
        rel_pos_bins=rel_pos_bins, max_rel_pos=max_rel_pos,
        rel_2d_pos_bins=rel_2d_pos_bins, max_rel_2d_pos=max_rel_2d_pos)
    out = jax.block_until_ready(out)

    # sanity check against a pure-JAX reference of the same math / dtypes
    bias_ref = build_rel_bias(attention_mask, position_ids, bbox, enc_params,
                              num_heads=nH, head_dim=head_dim,
                              rel_pos_bins=rel_pos_bins, max_rel_pos=max_rel_pos,
                              rel_2d_pos_bins=rel_2d_pos_bins,
                              max_rel_2d_pos=max_rel_2d_pos)
    act_dtype = jnp.bfloat16 if _supports_bf16_transcendentals() else jnp.float32
    ref = hidden
    for p in layer_params:
        ref = _layer_ref(ref, bias_ref, p, nH, head_dim, eps, act_dtype)

    assert jnp.allclose(out, ref, atol=3e-3), (
        "mismatch vs reference: max abs err = "
        f"{float(jnp.max(jnp.abs(out - ref)))}")

    print("KERNEL_OK")
</pallas_src>

<mosaic_0001>
module attributes {stable_mosaic.version = 11 : i64} {
  func.func @_layer_kernel(%arg0: i32, %arg1: i32, %arg2: memref<1x8x32xf32, #tpu.memory_space<vmem>>, %arg3: memref<1x8x32xf32, #tpu.memory_space<vmem>>, %arg4: memref<1x4x8x8xbf16, #tpu.memory_space<vmem>>, %arg5: memref<32x32xbf16, #tpu.memory_space<vmem>>, %arg6: memref<1x32xf32, #tpu.memory_space<vmem>>, %arg7: memref<32x32xbf16, #tpu.memory_space<vmem>>, %arg8: memref<1x32xf32, #tpu.memory_space<vmem>>, %arg9: memref<32x32xbf16, #tpu.memory_space<vmem>>, %arg10: memref<1x32xf32, #tpu.memory_space<vmem>>, %arg11: memref<4x8x32xbf16, #tpu.memory_space<vmem>>, %arg12: memref<1x32xf32, #tpu.memory_space<vmem>>, %arg13: memref<1x32xf32, #tpu.memory_space<vmem>>, %arg14: memref<1x32xf32, #tpu.memory_space<vmem>>, %arg15: memref<32x64xbf16, #tpu.memory_space<vmem>>, %arg16: memref<1x64xf32, #tpu.memory_space<vmem>>, %arg17: memref<64x32xbf16, #tpu.memory_space<vmem>>, %arg18: memref<1x32xf32, #tpu.memory_space<vmem>>, %arg19: memref<1x32xf32, #tpu.memory_space<vmem>>, %arg20: memref<1x32xf32, #tpu.memory_space<vmem>>, %arg21: memref<1x8x32xf32, #tpu.memory_space<vmem>>, %arg22: memref<4x8x8xbf16, #tpu.memory_space<vmem>>, %arg23: memref<4x8x8xbf16, #tpu.memory_space<vmem>>) attributes {dimension_semantics = [#tpu.dimension_semantics<parallel>, #tpu.dimension_semantics<arbitrary>], iteration_bounds = array<i64: 2, 1>, scalar_prefetch = 0 : i64, scratch_operands = 2 : i64, tpu.core_type = #tpu.core_type<tc>, window_params = [{transform_indices = @transform_0, window_bounds = array<i64: 1, 8, 32>}, {transform_indices = @transform_1, window_bounds = array<i64: 1, 8, 32>}, {transform_indices = @transform_2, window_bounds = array<i64: 1, 4, 8, 8>}, {pipeline_mode = #tpu.pipeline_mode<synchronous>, transform_indices = @transform_3, window_bounds = array<i64: 32, 32>}, {pipeline_mode = #tpu.pipeline_mode<synchronous>, transform_indices = @transform_4, window_bounds = array<i64: 1, 32>}, {pipeline_mode = #tpu.pipeline_mode<synchronous>, transform_indices = @transform_5, window_bounds = array<i64: 32, 32>}, {pipeline_mode = #tpu.pipeline_mode<synchronous>, transform_indices = @transform_6, window_bounds = array<i64: 1, 32>}, {pipeline_mode = #tpu.pipeline_mode<synchronous>, transform_indices = @transform_7, window_bounds = array<i64: 32, 32>}, {pipeline_mode = #tpu.pipeline_mode<synchronous>, transform_indices = @transform_8, window_bounds = array<i64: 1, 32>}, {pipeline_mode = #tpu.pipeline_mode<synchronous>, transform_indices = @transform_9, window_bounds = array<i64: 4, 8, 32>}, {pipeline_mode = #tpu.pipeline_mode<synchronous>, transform_indices = @transform_10, window_bounds = array<i64: 1, 32>}, {pipeline_mode = #tpu.pipeline_mode<synchronous>, transform_indices = @transform_11, window_bounds = array<i64: 1, 32>}, {pipeline_mode = #tpu.pipeline_mode<synchronous>, transform_indices = @transform_12, window_bounds = array<i64: 1, 32>}, {pipeline_mode = #tpu.pipeline_mode<synchronous>, transform_indices = @transform_13, window_bounds = array<i64: 32, 64>}, {pipeline_mode = #tpu.pipeline_mode<synchronous>, transform_indices = @transform_14, window_bounds = array<i64: 1, 64>}, {pipeline_mode = #tpu.pipeline_mode<synchronous>, transform_indices = @transform_15, window_bounds = array<i64: 64, 32>}, {pipeline_mode = #tpu.pipeline_mode<synchronous>, transform_indices = @transform_16, window_bounds = array<i64: 1, 32>}, {pipeline_mode = #tpu.pipeline_mode<synchronous>, transform_indices = @transform_17, window_bounds = array<i64: 1, 32>}, {pipeline_mode = #tpu.pipeline_mode<synchronous>, transform_indices = @transform_18, window_bounds = array<i64: 1, 32>}, {transform_indices = @transform_19, window_bounds = array<i64: 1, 8, 32>}]} {
    %c0_i32 = arith.constant 0 : i32
    %0 = arith.cmpi eq, %arg1, %c0_i32 : i32
    %1 = arith.extui %0 : i1 to i32
    %c0_i32_0 = arith.constant 0 : i32
    %2 = arith.cmpi ne, %1, %c0_i32_0 : i32
    scf.if %2 {
      %c0_63 = arith.constant 0 : index
      %c0_64 = arith.constant 0 : index
      %c0_65 = arith.constant 0 : index
      %124 = vector.load %arg2[%c0_63, %c0_64, %c0_65] : memref<1x8x32xf32, #tpu.memory_space<vmem>>, vector<1x8x32xf32>
      %125 = vector.shape_cast %124 : vector<1x8x32xf32> to vector<8x32xf32>
      %126 = arith.truncf %125 : vector<8x32xf32> to vector<8x32xbf16>
      %c0_66 = arith.constant 0 : index
      %c0_67 = arith.constant 0 : index
      %127 = vector.load %arg7[%c0_66, %c0_67] : memref<32x32xbf16, #tpu.memory_space<vmem>>, vector<32x32xbf16>
      %cst_68 = arith.constant dense<0.000000e+00> : vector<8x32xf32>
      %128 = tpu.matmul %126, %127, %cst_68 {dimension_numbers = #tpu.dot_dimension_numbers<[1], [0], [0], [1], [0, 0, 1, 1], [], []>} : vector<8x32xbf16>, vector<32x32xbf16>, vector<8x32xf32> -> vector<8x32xf32>
      %c0_69 = arith.constant 0 : index
      %c0_70 = arith.constant 0 : index
      %129 = vector.load %arg8[%c0_69, %c0_70] : memref<1x32xf32, #tpu.memory_space<vmem>>, vector<1x32xf32>
      %130 = vector.broadcast %129 : vector<1x32xf32> to vector<8x32xf32>
      %131 = arith.addf %128, %130 : vector<8x32xf32>
      %c0_71 = arith.constant 0 : index
      %c0_72 = arith.constant 0 : index
      %132 = vector.load %arg9[%c0_71, %c0_72] : memref<32x32xbf16, #tpu.memory_space<vmem>>, vector<32x32xbf16>
      %cst_73 = arith.constant dense<0.000000e+00> : vector<8x32xf32>
      %133 = tpu.matmul %126, %132, %cst_73 {dimension_numbers = #tpu.dot_dimension_numbers<[1], [0], [0], [1], [0, 0, 1, 1], [], []>} : vector<8x32xbf16>, vector<32x32xbf16>, vector<8x32xf32> -> vector<8x32xf32>
      %c0_74 = arith.constant 0 : index
      %c0_75 = arith.constant 0 : index
      %134 = vector.load %arg10[%c0_74, %c0_75] : memref<1x32xf32, #tpu.memory_space<vmem>>, vector<1x32xf32>
      %135 = vector.broadcast %134 : vector<1x32xf32> to vector<8x32xf32>
      %136 = arith.addf %133, %135 : vector<8x32xf32>
      %137 = arith.truncf %131 : vector<8x32xf32> to vector<8x32xbf16>
      %138 = arith.truncf %136 : vector<8x32xf32> to vector<8x32xbf16>
      %139 = vector.extract_strided_slice %137 {offsets = [0, 0], sizes = [8, 8], strides = [1, 1]} : vector<8x32xbf16> to vector<8x8xbf16>
      %c0_76 = arith.constant 0 : index
      %c0_77 = arith.constant 0 : index
      %c0_78 = arith.constant 0 : index
      %140 = vector.load %arg22[%c0_76, %c0_77, %c0_78] : memref<4x8x8xbf16, #tpu.memory_space<vmem>>, vector<1x8x8xbf16>
      %141 = vector.shape_cast %140 : vector<1x8x8xbf16> to vector<8x8xbf16>
      %142 = vector.shape_cast %139 : vector<8x8xbf16> to vector<1x8x8xbf16>
      tpu.vector_store %arg22[%c0_76, %c0_77, %c0_78], %142 {strides = array<i32>} : memref<4x8x8xbf16, #tpu.memory_space<vmem>>, vector<1x8x8xbf16>,
      %143 = vector.extract_strided_slice %138 {offsets = [0, 0], sizes = [8, 8], strides = [1, 1]} : vector<8x32xbf16> to vector<8x8xbf16>
      %c0_79 = arith.constant 0 : index
      %c0_80 = arith.constant 0 : index
      %c0_81 = arith.constant 0 : index
      %144 = vector.load %arg23[%c0_79, %c0_80, %c0_81] : memref<4x8x8xbf16, #tpu.memory_space<vmem>>, vector<1x8x8xbf16>
      %145 = vector.shape_cast %144 : vector<1x8x8xbf16> to vector<8x8xbf16>
      %146 = vector.shape_cast %143 : vector<8x8xbf16> to vector<1x8x8xbf16>
      tpu.vector_store %arg23[%c0_79, %c0_80, %c0_81], %146 {strides = array<i32>} : memref<4x8x8xbf16, #tpu.memory_space<vmem>>, vector<1x8x8xbf16>,
      %147 = vector.extract_strided_slice %137 {offsets = [0, 8], sizes = [8, 8], strides = [1, 1]} : vector<8x32xbf16> to vector<8x8xbf16>
      %c1 = arith.constant 1 : index
      %c0_82 = arith.constant 0 : index
      %c0_83 = arith.constant 0 : index
      %148 = vector.load %arg22[%c1, %c0_82, %c0_83] : memref<4x8x8xbf16, #tpu.memory_space<vmem>>, vector<1x8x8xbf16>
      %149 = vector.shape_cast %148 : vector<1x8x8xbf16> to vector<8x8xbf16>
      %150 = vector.shape_cast %147 : vector<8x8xbf16> to vector<1x8x8xbf16>
      tpu.vector_store %arg22[%c1, %c0_82, %c0_83], %150 {strides = array<i32>} : memref<4x8x8xbf16, #tpu.memory_space<vmem>>, vector<1x8x8xbf16>,
      %151 = vector.extract_strided_slice %138 {offsets = [0, 8], sizes = [8, 8], strides = [1, 1]} : vector<8x32xbf16> to vector<8x8xbf16>
      %c1_84 = arith.constant 1 : index
      %c0_85 = arith.constant 0 : index
      %c0_86 = arith.constant 0 : index
      %152 = vector.load %arg23[%c1_84, %c0_85, %c0_86] : memref<4x8x8xbf16, #tpu.memory_space<vmem>>, vector<1x8x8xbf16>
      %153 = vector.shape_cast %152 : vector<1x8x8xbf16> to vector<8x8xbf16>
      %154 = vector.shape_cast %151 : vector<8x8xbf16> to vector<1x8x8xbf16>
      tpu.vector_store %arg23[%c1_84, %c0_85, %c0_86], %154 {strides = array<i32>} : memref<4x8x8xbf16, #tpu.memory_space<vmem>>, vector<1x8x8xbf16>,
      %155 = vector.extract_strided_slice %137 {offsets = [0, 16], sizes = [8, 8], strides = [1, 1]} : vector<8x32xbf16> to vector<8x8xbf16>
      %c2 = arith.constant 2 : index
      %c0_87 = arith.constant 0 : index
      %c0_88 = arith.constant 0 : index
      %156 = vector.load %arg22[%c2, %c0_87, %c0_88] : memref<4x8x8xbf16, #tpu.memory_space<vmem>>, vector<1x8x8xbf16>
      %157 = vector.shape_cast %156 : vector<1x8x8xbf16> to vector<8x8xbf16>
      %158 = vector.shape_cast %155 : vector<8x8xbf16> to vector<1x8x8xbf16>
      tpu.vector_store %arg22[%c2, %c0_87, %c0_88], %158 {strides = array<i32>} : memref<4x8x8xbf16, #tpu.memory_space<vmem>>, vector<1x8x8xbf16>,
      %159 = vector.extract_strided_slice %138 {offsets = [0, 16], sizes = [8, 8], strides = [1, 1]} : vector<8x32xbf16> to vector<8x8xbf16>
      %c2_89 = arith.constant 2 : index
      %c0_90 = arith.constant 0 : index
      %c0_91 = arith.constant 0 : index
      %160 = vector.load %arg23[%c2_89, %c0_90, %c0_91] : memref<4x8x8xbf16, #tpu.memory_space<vmem>>, vector<1x8x8xbf16>
      %161 = vector.shape_cast %160 : vector<1x8x8xbf16> to vector<8x8xbf16>
      %162 = vector.shape_cast %159 : vector<8x8xbf16> to vector<1x8x8xbf16>
      tpu.vector_store %arg23[%c2_89, %c0_90, %c0_91], %162 {strides = array<i32>} : memref<4x8x8xbf16, #tpu.memory_space<vmem>>, vector<1x8x8xbf16>,
      %163 = vector.extract_strided_slice %137 {offsets = [0, 24], sizes = [8, 8], strides = [1, 1]} : vector<8x32xbf16> to vector<8x8xbf16>
      %c3 = arith.constant 3 : index
      %c0_92 = arith.constant 0 : index
      %c0_93 = arith.constant 0 : index
      %164 = vector.load %arg22[%c3, %c0_92, %c0_93] : memref<4x8x8xbf16, #tpu.memory_space<vmem>>, vector<1x8x8xbf16>
      %165 = vector.shape_cast %164 : vector<1x8x8xbf16> to vector<8x8xbf16>
      %166 = vector.shape_cast %163 : vector<8x8xbf16> to vector<1x8x8xbf16>
      tpu.vector_store %arg22[%c3, %c0_92, %c0_93], %166 {strides = array<i32>} : memref<4x8x8xbf16, #tpu.memory_space<vmem>>, vector<1x8x8xbf16>,
      %167 = vector.extract_strided_slice %138 {offsets = [0, 24], sizes = [8, 8], strides = [1, 1]} : vector<8x32xbf16> to vector<8x8xbf16>
      %c3_94 = arith.constant 3 : index
      %c0_95 = arith.constant 0 : index
      %c0_96 = arith.constant 0 : index
      %168 = vector.load %arg23[%c3_94, %c0_95, %c0_96] : memref<4x8x8xbf16, #tpu.memory_space<vmem>>, vector<1x8x8xbf16>
      %169 = vector.shape_cast %168 : vector<1x8x8xbf16> to vector<8x8xbf16>
      %170 = vector.shape_cast %167 : vector<8x8xbf16> to vector<1x8x8xbf16>
      tpu.vector_store %arg23[%c3_94, %c0_95, %c0_96], %170 {strides = array<i32>} : memref<4x8x8xbf16, #tpu.memory_space<vmem>>, vector<1x8x8xbf16>,
    } else {
    }
    %c0 = arith.constant 0 : index
    %c0_1 = arith.constant 0 : index
    %c0_2 = arith.constant 0 : index
    %3 = vector.load %arg3[%c0, %c0_1, %c0_2] : memref<1x8x32xf32, #tpu.memory_space<vmem>>, vector<1x8x32xf32>
    %4 = vector.shape_cast %3 : vector<1x8x32xf32> to vector<8x32xf32>
    %5 = arith.truncf %4 : vector<8x32xf32> to vector<8x32xbf16>
    %c0_3 = arith.constant 0 : index
    %c0_4 = arith.constant 0 : index
    %6 = vector.load %arg5[%c0_3, %c0_4] : memref<32x32xbf16, #tpu.memory_space<vmem>>, vector<32x32xbf16>
    %cst = arith.constant dense<0.000000e+00> : vector<8x32xf32>
    %7 = tpu.matmul %5, %6, %cst {dimension_numbers = #tpu.dot_dimension_numbers<[1], [0], [0], [1], [0, 0, 1, 1], [], []>} : vector<8x32xbf16>, vector<32x32xbf16>, vector<8x32xf32> -> vector<8x32xf32>
    %c0_5 = arith.constant 0 : index
    %c0_6 = arith.constant 0 : index
    %8 = vector.load %arg6[%c0_5, %c0_6] : memref<1x32xf32, #tpu.memory_space<vmem>>, vector<1x32xf32>
    %9 = vector.broadcast %8 : vector<1x32xf32> to vector<8x32xf32>
    %10 = arith.addf %7, %9 : vector<8x32xf32>
    %cst_7 = arith.constant 0.353553385 : f32
    %11 = vector.broadcast %cst_7 : f32 to vector<8x32xf32>
    %12 = arith.mulf %10, %11 : vector<8x32xf32>
    %13 = arith.truncf %12 : vector<8x32xf32> to vector<8x32xbf16>
    %14 = vector.extract_strided_slice %13 {offsets = [0, 0], sizes = [8, 8], strides = [1, 1]} : vector<8x32xbf16> to vector<8x8xbf16>
    %15 = vector.extract_strided_slice %13 {offsets = [0, 8], sizes = [8, 8], strides = [1, 1]} : vector<8x32xbf16> to vector<8x8xbf16>
    %16 = vector.extract_strided_slice %13 {offsets = [0, 16], sizes = [8, 8], strides = [1, 1]} : vector<8x32xbf16> to vector<8x8xbf16>
    %17 = vector.extract_strided_slice %13 {offsets = [0, 24], sizes = [8, 8], strides = [1, 1]} : vector<8x32xbf16> to vector<8x8xbf16>
    %18 = vector.shape_cast %14 : vector<8x8xbf16> to vector<1x8x8xbf16>
    %19 = vector.shape_cast %15 : vector<8x8xbf16> to vector<1x8x8xbf16>
    %20 = vector.shape_cast %16 : vector<8x8xbf16> to vector<1x8x8xbf16>
    %21 = vector.shape_cast %17 : vector<8x8xbf16> to vector<1x8x8xbf16>
    %22 = tpu.concatenate %18, %19, %20, %21 in 0 : vector<1x8x8xbf16>, vector<1x8x8xbf16>, vector<1x8x8xbf16>, vector<1x8x8xbf16> -> vector<4x8x8xbf16>
    %c0_8 = arith.constant 0 : index
    %c0_9 = arith.constant 0 : index
    %c0_10 = arith.constant 0 : index
    %23 = vector.load %arg22[%c0_8, %c0_9, %c0_10] : memref<4x8x8xbf16, #tpu.memory_space<vmem>>, vector<4x8x8xbf16>
    %c0_11 = arith.constant 0 : index
    %c0_12 = arith.constant 0 : index
    %c0_13 = arith.constant 0 : index
    %24 = vector.load %arg23[%c0_11, %c0_12, %c0_13] : memref<4x8x8xbf16, #tpu.memory_space<vmem>>, vector<4x8x8xbf16>
    %cst_14 = arith.constant dense<0.000000e+00> : vector<4x8x8xf32>
    %25 = tpu.matmul %22, %23, %cst_14 {dimension_numbers = #tpu.dot_dimension_numbers<[2], [2], [1], [1], [0, 0, 0, 1, 1, 1], [0], [0]>} : vector<4x8x8xbf16>, vector<4x8x8xbf16>, vector<4x8x8xf32> -> vector<4x8x8xf32>
    %c0_15 = arith.constant 0 : index
    %c0_16 = arith.constant 0 : index
    %c0_17 = arith.constant 0 : index
    %c0_18 = arith.constant 0 : index
    %26 = vector.load %arg4[%c0_15, %c0_16, %c0_17, %c0_18] : memref<1x4x8x8xbf16, #tpu.memory_space<vmem>>, vector<1x4x8x8xbf16>
    %27 = vector.shape_cast %26 : vector<1x4x8x8xbf16> to vector<4x8x8xbf16>
    %28 = arith.extf %27 : vector<4x8x8xbf16> to vector<4x8x8xf32>
    %29 = arith.addf %25, %28 : vector<4x8x8xf32>
    %cst_19 = arith.constant dense<0xFF800000> : vector<4x8xf32>
    %30 = vector.multi_reduction <maximumf>, %29, %cst_19 [2] : vector<4x8x8xf32> to vector<4x8xf32>
    %31 = vector.shape_cast %30 : vector<4x8xf32> to vector<4x8x1xf32>
    %32 = vector.broadcast %31 : vector<4x8x1xf32> to vector<4x8x8xf32>
    %33 = arith.subf %29, %32 : vector<4x8x8xf32>
    %34 = arith.truncf %33 : vector<4x8x8xf32> to vector<4x8x8xbf16>
    %35 = math.exp %34 : vector<4x8x8xbf16>
    %36 = arith.extf %35 : vector<4x8x8xbf16> to vector<4x8x8xf32>
    %cst_20 = arith.constant dense<0.000000e+00> : vector<4x8xf32>
    %37 = vector.multi_reduction <add>, %36, %cst_20 [2] : vector<4x8x8xf32> to vector<4x8xf32>
    %38 = vector.shape_cast %37 : vector<4x8xf32> to vector<4x8x1xf32>
    %cst_21 = arith.constant dense<0.000000e+00> : vector<4x8x8xf32>
    %39 = tpu.matmul %35, %24, %cst_21 {dimension_numbers = #tpu.dot_dimension_numbers<[2], [1], [1], [2], [0, 0, 0, 1, 1, 2], [0], [0]>} : vector<4x8x8xbf16>, vector<4x8x8xbf16>, vector<4x8x8xf32> -> vector<4x8x8xf32>
    %40 = tpu.reciprocal %38 {approx = true} : vector<4x8x1xf32> -> vector<4x8x1xf32>
    %41 = vector.broadcast %40 : vector<4x8x1xf32> to vector<4x8x8xf32>
    %42 = arith.mulf %39, %41 : vector<4x8x8xf32>
    %43 = arith.truncf %42 : vector<4x8x8xf32> to vector<4x8x8xbf16>
    %c0_22 = arith.constant 0 : index
    %c0_23 = arith.constant 0 : index
    %c0_24 = arith.constant 0 : index
    %44 = vector.load %arg11[%c0_22, %c0_23, %c0_24] : memref<4x8x32xbf16, #tpu.memory_space<vmem>>, vector<4x8x32xbf16>
    %cst_25 = arith.constant dense<0.000000e+00> : vector<4x8x32xf32>
    %45 = tpu.matmul %43, %44, %cst_25 {dimension_numbers = #tpu.dot_dimension_numbers<[2], [1], [1], [2], [0, 0, 0, 1, 1, 2], [0], [0]>} : vector<4x8x8xbf16>, vector<4x8x32xbf16>, vector<4x8x32xf32> -> vector<4x8x32xf32>
    %cst_26 = arith.constant dense<0.000000e+00> : vector<8x32xf32>
    %46 = vector.multi_reduction <add>, %45, %cst_26 [0] : vector<4x8x32xf32> to vector<8x32xf32>
    %c0_27 = arith.constant 0 : index
    %c0_28 = arith.constant 0 : index
    %47 = vector.load %arg12[%c0_27, %c0_28] : memref<1x32xf32, #tpu.memory_space<vmem>>, vector<1x32xf32>
    %48 = vector.broadcast %47 : vector<1x32xf32> to vector<8x32xf32>
    %49 = arith.addf %46, %48 : vector<8x32xf32>
    %50 = arith.addf %49, %4 : vector<8x32xf32>
    %cst_29 = arith.constant dense<0.000000e+00> : vector<8xf32>
    %51 = vector.multi_reduction <add>, %50, %cst_29 [1] : vector<8x32xf32> to vector<8xf32>
    %52 = vector.shape_cast %51 : vector<8xf32> to vector<8x1xf32>
    %cst_30 = arith.constant 3.200000e+01 : f32
    %53 = vector.broadcast %cst_30 : f32 to vector<8x1xf32>
    %54 = arith.divf %52, %53 : vector<8x1xf32>
    %55 = vector.broadcast %54 : vector<8x1xf32> to vector<8x32xf32>
    %56 = arith.subf %50, %55 : vector<8x32xf32>
    %57 = arith.mulf %56, %56 : vector<8x32xf32>
    %cst_31 = arith.constant dense<0.000000e+00> : vector<8xf32>
    %58 = vector.multi_reduction <add>, %57, %cst_31 [1] : vector<8x32xf32> to vector<8xf32>
    %59 = vector.shape_cast %58 : vector<8xf32> to vector<8x1xf32>
    %cst_32 = arith.constant 3.200000e+01 : f32
    %60 = vector.broadcast %cst_32 : f32 to vector<8x1xf32>
    %61 = arith.divf %59, %60 : vector<8x1xf32>
    %62 = vector.broadcast %54 : vector<8x1xf32> to vector<8x32xf32>
    %63 = arith.subf %50, %62 : vector<8x32xf32>
    %cst_33 = arith.constant 9.99999974E-6 : f32
    %64 = vector.broadcast %cst_33 : f32 to vector<8x1xf32>
    %65 = arith.addf %61, %64 : vector<8x1xf32>
    %66 = math.rsqrt %65 : vector<8x1xf32>
    %67 = vector.broadcast %66 : vector<8x1xf32> to vector<8x32xf32>
    %68 = arith.mulf %63, %67 : vector<8x32xf32>
    %c0_34 = arith.constant 0 : index
    %c0_35 = arith.constant 0 : index
    %69 = vector.load %arg13[%c0_34, %c0_35] : memref<1x32xf32, #tpu.memory_space<vmem>>, vector<1x32xf32>
    %70 = vector.broadcast %69 : vector<1x32xf32> to vector<8x32xf32>
    %71 = arith.mulf %68, %70 : vector<8x32xf32>
    %c0_36 = arith.constant 0 : index
    %c0_37 = arith.constant 0 : index
    %72 = vector.load %arg14[%c0_36, %c0_37] : memref<1x32xf32, #tpu.memory_space<vmem>>, vector<1x32xf32>
    %73 = vector.broadcast %72 : vector<1x32xf32> to vector<8x32xf32>
    %74 = arith.addf %71, %73 : vector<8x32xf32>
    %75 = arith.truncf %74 : vector<8x32xf32> to vector<8x32xbf16>
    %c0_38 = arith.constant 0 : index
    %c0_39 = arith.constant 0 : index
    %76 = vector.load %arg15[%c0_38, %c0_39] : memref<32x64xbf16, #tpu.memory_space<vmem>>, vector<32x64xbf16>
    %cst_40 = arith.constant dense<0.000000e+00> : vector<8x64xf32>
    %77 = tpu.matmul %75, %76, %cst_40 {dimension_numbers = #tpu.dot_dimension_numbers<[1], [0], [0], [1], [0, 0, 1, 1], [], []>} : vector<8x32xbf16>, vector<32x64xbf16>, vector<8x64xf32> -> vector<8x64xf32>
    %c0_41 = arith.constant 0 : index
    %c0_42 = arith.constant 0 : index
    %78 = vector.load %arg16[%c0_41, %c0_42] : memref<1x64xf32, #tpu.memory_space<vmem>>, vector<1x64xf32>
    %79 = vector.broadcast %78 : vector<1x64xf32> to vector<8x64xf32>
    %80 = arith.addf %77, %79 : vector<8x64xf32>
    %cst_43 = arith.constant 0.707106769 : f32
    %81 = vector.broadcast %cst_43 : f32 to vector<8x64xf32>
    %82 = arith.mulf %80, %81 : vector<8x64xf32>
    %83 = math.erf %82 : vector<8x64xf32>
    %84 = arith.truncf %83 : vector<8x64xf32> to vector<8x64xbf16>
    %85 = arith.truncf %80 : vector<8x64xf32> to vector<8x64xbf16>
    %cst_44 = arith.constant 5.000000e-01 : bf16
    %86 = vector.broadcast %cst_44 : bf16 to vector<8x64xbf16>
    %87 = arith.mulf %86, %85 : vector<8x64xbf16>
    %cst_45 = arith.constant 1.000000e+00 : bf16
    %88 = vector.broadcast %cst_45 : bf16 to vector<8x64xbf16>
    %89 = arith.addf %88, %84 : vector<8x64xbf16>
    %90 = arith.mulf %87, %89 : vector<8x64xbf16>
    %c0_46 = arith.constant 0 : index
    %c0_47 = arith.constant 0 : index
    %91 = vector.load %arg17[%c0_46, %c0_47] : memref<64x32xbf16, #tpu.memory_space<vmem>>, vector<64x32xbf16>
    %cst_48 = arith.constant dense<0.000000e+00> : vector<8x32xf32>
    %92 = tpu.matmul %90, %91, %cst_48 {dimension_numbers = #tpu.dot_dimension_numbers<[1], [0], [0], [1], [0, 0, 1, 1], [], []>} : vector<8x64xbf16>, vector<64x32xbf16>, vector<8x32xf32> -> vector<8x32xf32>
    %c0_49 = arith.constant 0 : index
    %c0_50 = arith.constant 0 : index
    %93 = vector.load %arg18[%c0_49, %c0_50] : memref<1x32xf32, #tpu.memory_space<vmem>>, vector<1x32xf32>
    %94 = vector.broadcast %93 : vector<1x32xf32> to vector<8x32xf32>
    %95 = arith.addf %92, %94 : vector<8x32xf32>
    %96 = arith.addf %95, %74 : vector<8x32xf32>
    %cst_51 = arith.constant dense<0.000000e+00> : vector<8xf32>
    %97 = vector.multi_reduction <add>, %96, %cst_51 [1] : vector<8x32xf32> to vector<8xf32>
    %98 = vector.shape_cast %97 : vector<8xf32> to vector<8x1xf32>
    %cst_52 = arith.constant 3.200000e+01 : f32
    %99 = vector.broadcast %cst_52 : f32 to vector<8x1xf32>
    %100 = arith.divf %98, %99 : vector<8x1xf32>
    %101 = vector.broadcast %100 : vector<8x1xf32> to vector<8x32xf32>
    %102 = arith.subf %96, %101 : vector<8x32xf32>
    %103 = arith.mulf %102, %102 : vector<8x32xf32>
    %cst_53 = arith.constant dense<0.000000e+00> : vector<8xf32>
    %104 = vector.multi_reduction <add>, %103, %cst_53 [1] : vector<8x32xf32> to vector<8xf32>
    %105 = vector.shape_cast %104 : vector<8xf32> to vector<8x1xf32>
    %cst_54 = arith.constant 3.200000e+01 : f32
    %106 = vector.broadcast %cst_54 : f32 to vector<8x1xf32>
    %107 = arith.divf %105, %106 : vector<8x1xf32>
    %108 = vector.broadcast %100 : vector<8x1xf32> to vector<8x32xf32>
    %109 = arith.subf %96, %108 : vector<8x32xf32>
    %cst_55 = arith.constant 9.99999974E-6 : f32
    %110 = vector.broadcast %cst_55 : f32 to vector<8x1xf32>
    %111 = arith.addf %107, %110 : vector<8x1xf32>
    %112 = math.rsqrt %111 : vector<8x1xf32>
    %113 = vector.broadcast %112 : vector<8x1xf32> to vector<8x32xf32>
    %114 = arith.mulf %109, %113 : vector<8x32xf32>
    %c0_56 = arith.constant 0 : index
    %c0_57 = arith.constant 0 : index
    %115 = vector.load %arg19[%c0_56, %c0_57] : memref<1x32xf32, #tpu.memory_space<vmem>>, vector<1x32xf32>
    %116 = vector.broadcast %115 : vector<1x32xf32> to vector<8x32xf32>
    %117 = arith.mulf %114, %116 : vector<8x32xf32>
    %c0_58 = arith.constant 0 : index
    %c0_59 = arith.constant 0 : index
    %118 = vector.load %arg20[%c0_58, %c0_59] : memref<1x32xf32, #tpu.memory_space<vmem>>, vector<1x32xf32>
    %119 = vector.broadcast %118 : vector<1x32xf32> to vector<8x32xf32>
    %120 = arith.addf %117, %119 : vector<8x32xf32>
    %c0_60 = arith.constant 0 : index
    %c0_61 = arith.constant 0 : index
    %c0_62 = arith.constant 0 : index
    %121 = vector.load %arg21[%c0_60, %c0_61, %c0_62] : memref<1x8x32xf32, #tpu.memory_space<vmem>>, vector<1x8x32xf32>
    %122 = vector.shape_cast %121 : vector<1x8x32xf32> to vector<8x32xf32>
    %123 = vector.shape_cast %120 : vector<8x32xf32> to vector<1x8x32xf32>
    tpu.vector_store %arg21[%c0_60, %c0_61, %c0_62], %123 {strides = array<i32>} : memref<1x8x32xf32, #tpu.memory_space<vmem>>, vector<1x8x32xf32>,
    return
  }
  func.func @transform_0(%arg0: i32, %arg1: i32) -> (i32, i32, i32) {
    %c0_i32 = arith.constant 0 : i32
    %c0_i32_0 = arith.constant 0 : i32
    %c0_i32_1 = arith.constant 0 : i32
    return %arg0, %c0_i32, %c0_i32_0 : i32, i32, i32
  }
  func.func @transform_1(%arg0: i32, %arg1: i32) -> (i32, i32, i32) {
    %c0_i32 = arith.constant 0 : i32
    %c0_i32_0 = arith.constant 0 : i32
    return %arg0, %arg1, %c0_i32 : i32, i32, i32
  }
  func.func @transform_2(%arg0: i32, %arg1: i32) -> (i32, i32, i32, i32) {
    %c0_i32 = arith.constant 0 : i32
    %c0_i32_0 = arith.constant 0 : i32
    %c0_i32_1 = arith.constant 0 : i32
    return %arg0, %c0_i32, %arg1, %c0_i32_0 : i32, i32, i32, i32
  }
  func.func @transform_3(%arg0: i32, %arg1: i32) -> (i32, i32) {
    %c0_i32 = arith.constant 0 : i32
    %c0_i32_0 = arith.constant 0 : i32
    %c0_i32_1 = arith.constant 0 : i32
    return %c0_i32, %c0_i32_0 : i32, i32
  }
  func.func @transform_4(%arg0: i32, %arg1: i32) -> (i32, i32) {
    %c0_i32 = arith.constant 0 : i32
    %c0_i32_0 = arith.constant 0 : i32
    %c0_i32_1 = arith.constant 0 : i32
    return %c0_i32, %c0_i32_0 : i32, i32
  }
  func.func @transform_5(%arg0: i32, %arg1: i32) -> (i32, i32) {
    %c0_i32 = arith.constant 0 : i32
    %c0_i32_0 = arith.constant 0 : i32
    %c0_i32_1 = arith.constant 0 : i32
    return %c0_i32, %c0_i32_0 : i32, i32
  }
  func.func @transform_6(%arg0: i32, %arg1: i32) -> (i32, i32) {
    %c0_i32 = arith.constant 0 : i32
    %c0_i32_0 = arith.constant 0 : i32
    %c0_i32_1 = arith.constant 0 : i32
    return %c0_i32, %c0_i32_0 : i32, i32
  }
  func.func @transform_7(%arg0: i32, %arg1: i32) -> (i32, i32) {
    %c0_i32 = arith.constant 0 : i32
    %c0_i32_0 = arith.constant 0 : i32
    %c0_i32_1 = arith.constant 0 : i32
    return %c0_i32, %c0_i32_0 : i32, i32
  }
  func.func @transform_8(%arg0: i32, %arg1: i32) -> (i32, i32) {
    %c0_i32 = arith.constant 0 : i32
    %c0_i32_0 = arith.constant 0 : i32
    %c0_i32_1 = arith.constant 0 : i32
    return %c0_i32, %c0_i32_0 : i32, i32
  }
  func.func @transform_9(%arg0: i32, %arg1: i32) -> (i32, i32, i32) {
    %c0_i32 = arith.constant 0 : i32
    %c0_i32_0 = arith.constant 0 : i32
    %c0_i32_1 = arith.constant 0 : i32
    %c0_i32_2 = arith.constant 0 : i32
    return %c0_i32, %c0_i32_0, %c0_i32_1 : i32, i32, i32
  }
  func.func @transform_10(%arg0: i32, %arg1: i32) -> (i32, i32) {
    %c0_i32 = arith.constant 0 : i32
    %c0_i32_0 = arith.constant 0 : i32
    %c0_i32_1 = arith.constant 0 : i32
    return %c0_i32, %c0_i32_0 : i32, i32
  }
  func.func @transform_11(%arg0: i32, %arg1: i32) -> (i32, i32) {
    %c0_i32 = arith.constant 0 : i32
    %c0_i32_0 = arith.constant 0 : i32
    %c0_i32_1 = arith.constant 0 : i32
    return %c0_i32, %c0_i32_0 : i32, i32
  }
  func.func @transform_12(%arg0: i32, %arg1: i32) -> (i32, i32) {
    %c0_i32 = arith.constant 0 : i32
    %c0_i32_0 = arith.constant 0 : i32
    %c0_i32_1 = arith.constant 0 : i32
    return %c0_i32, %c0_i32_0 : i32, i32
  }
  func.func @transform_13(%arg0: i32, %arg1: i32) -> (i32, i32) {
    %c0_i32 = arith.constant 0 : i32
    %c0_i32_0 = arith.constant 0 : i32
    %c0_i32_1 = arith.constant 0 : i32
    return %c0_i32, %c0_i32_0 : i32, i32
  }
  func.func @transform_14(%arg0: i32, %arg1: i32) -> (i32, i32) {
    %c0_i32 = arith.constant 0 : i32
    %c0_i32_0 = arith.constant 0 : i32
    %c0_i32_1 = arith.constant 0 : i32
    return %c0_i32, %c0_i32_0 : i32, i32
  }
  func.func @transform_15(%arg0: i32, %arg1: i32) -> (i32, i32) {
    %c0_i32 = arith.constant 0 : i32
    %c0_i32_0 = arith.constant 0 : i32
    %c0_i32_1 = arith.constant 0 : i32
    return %c0_i32, %c0_i32_0 : i32, i32
  }
  func.func @transform_16(%arg0: i32, %arg1: i32) -> (i32, i32) {
    %c0_i32 = arith.constant 0 : i32
    %c0_i32_0 = arith.constant 0 : i32
    %c0_i32_1 = arith.constant 0 : i32
    return %c0_i32, %c0_i32_0 : i32, i32
  }
  func.func @transform_17(%arg0: i32, %arg1: i32) -> (i32, i32) {
    %c0_i32 = arith.constant 0 : i32
    %c0_i32_0 = arith.constant 0 : i32
    %c0_i32_1 = arith.constant 0 : i32
    return %c0_i32, %c0_i32_0 : i32, i32
  }
  func.func @transform_18(%arg0: i32, %arg1: i32) -> (i32, i32) {
    %c0_i32 = arith.constant 0 : i32
    %c0_i32_0 = arith.constant 0 : i32
    %c0_i32_1 = arith.constant 0 : i32
    return %c0_i32, %c0_i32_0 : i32, i32
  }
  func.func @transform_19(%arg0: i32, %arg1: i32) -> (i32, i32, i32) {
    %c0_i32 = arith.constant 0 : i32
    %c0_i32_0 = arith.constant 0 : i32
    return %arg0, %arg1, %c0_i32 : i32, i32, i32
  }
}

</mosaic_0001>

<bundles_post_ra>
// kernel: tpu_custom_call.1
= control target key start
LH: loop header
LB: loop body
LE: loop exit
PB: predicated region body
PF: predicated region fallthrough
CT: control target
= control target key end

     0   :  { %s3587_s0 = inlined_call_operand.vmem [shape: f32[2,8,32], index: 0, kind: input, shape index: {}]   ;;  %s3588_s1 = inlined_call_operand.hbm [shape: f32[2,8,32], index: 1, kind: input, shape index: {}]   ;;  %s3589_s2 = inlined_call_operand.vmem [shape: bf16[2,4,8,8], index: 2, kind: input, shape index: {}]   ;;  %s3590_s3 = inlined_call_operand.hbm [shape: bf16[32,32], index: 3, kind: input, shape index: {}]   ;;  %s3591_s4 = inlined_call_operand.vmem [shape: f32[1,32], index: 4, kind: input, shape index: {}]   ;;  %s3592_s5 = inlined_call_operand.hbm [shape: bf16[32,32], index: 5, kind: input, shape index: {}]   ;;  %s3593_s6 = inlined_call_operand.hbm [shape: f32[1,32], index: 6, kind: input, shape index: {}]   ;;  %s3594_s7 = inlined_call_operand.hbm [shape: bf16[32,32], index: 7, kind: input, shape index: {}]   ;;  %s3595_s8 = inlined_call_operand.hbm [shape: f32[1,32], index: 8, kind: input, shape index: {}]   ;;  %s3596_s9 = inlined_call_operand.vmem [shape: bf16[4,8,32], index: 9, kind: input, shape index: {}]   ;;  %s3597_s10 = inlined_call_operand.hbm [shape: f32[1,32], index: 10, kind: input, shape index: {}]   ;;  %s3598_s11 = inlined_call_operand.hbm [shape: f32[1,32], index: 11, kind: input, shape index: {}]   ;;  %s3599_s12 = inlined_call_operand.hbm [shape: f32[1,32], index: 12, kind: input, shape index: {}]   ;;  %s3600_s13 = inlined_call_operand.vmem [shape: bf16[32,64], index: 13, kind: input, shape index: {}]   ;;  %s3601_s14 = inlined_call_operand.vmem [shape: f32[1,64], index: 14, kind: input, shape index: {}]   ;;  %s3602_s15 = inlined_call_operand.vmem [shape: bf16[64,32], index: 15, kind: input, shape index: {}]   ;;  %s3603_s16 = inlined_call_operand.vmem [shape: f32[1,32], index: 16, kind: input, shape index: {}]   ;;  %s3604_s17 = inlined_call_operand.vmem [shape: f32[1,32], index: 17, kind: input, shape index: {}]   ;;  %s3605_s18 = inlined_call_operand.vmem [shape: f32[1,32], index: 18, kind: input, shape index: {}]   ;;  %s3606_s19 = inlined_call_operand.hbm [shape: f32[2,8,32], index: 19, kind: output, shape index: {}]  }
   0x1   :  { %3622 = sst [smem:[#allocation27_spill]] %s3587_s0 }
   0x2   :  { %3623 = sst [smem:[#allocation28_spill]] %s3588_s1 }
   0x3   :  { %3624 = sst [smem:[#allocation29_spill]] %s3589_s2 }
   0x4   :  { %3625 = sst [smem:[#allocation30_spill]] %s3590_s3 }
   0x5   :  { %3626 = sst [smem:[#allocation31_spill]] %s3591_s4 }
   0x6   :  { %3627 = sst [smem:[#allocation32_spill]] %s3592_s5 }
   0x7   :  { %3628 = sst [smem:[#allocation33_spill]] %s3593_s6 }
   0x8   :  { %3629 = sst [smem:[#allocation34_spill]] %s3594_s7 }
   0x9   :  { %3630 = sst [smem:[#allocation35_spill]] %s3595_s8 }
   0xa   :  { %3631 = sst [smem:[#allocation36_spill]] %s3596_s9 }
   0xb   :  { %3632 = sst [smem:[#allocation37_spill]] %s3597_s10 }
   0xc   :  { %3633 = sst [smem:[#allocation38_spill]] %s3600_s13 }
   0xd   :  { %3634 = sst [smem:[#allocation39_spill]] %s3601_s14 }
   0xe   :  { %3635 = sst [smem:[#allocation40_spill]] %s3602_s15 }
   0xf   :  { %3636 = sst [smem:[#allocation41_spill]] %s3603_s16 }
  0x10   :  { %3637 = sst [smem:[#allocation42_spill]] %s3604_s17 }
  0x11   :  { %3638 = sst [smem:[#allocation43_spill]] %s3605_s18 }
  0x12   :  { %3639 = sst [smem:[#allocation44_spill]] %s3606_s19 }
  0x13   :  { %24 = vsyncpa [#allocation5], 0 }
  0x14   :  { %26 = vsyncpa [#allocation5 + $0x1], 0 }
  0x15   :  { %27 = vsyncpa [#allocation8], 0 }
  0x16   :  { %28 = vsyncpa [#allocation11], 0 }
  0x17   :  { %29 = vsyncpa [#allocation14], 0 }
  0x18   :  { %30 = vsyncpa [#allocation17], 0 }
  0x19   :  { %31 = vsyncpa [#allocation6], 0 }
  0x1a   :  { %33 = vsyncpa [#allocation6 + $0x1], 0  ;;  %s3013_s0 = smov 0   ;;  %s3015_s30 = smov 0  }
  0x1b   :  { %s3017_s20 = smov 0   ;;  %s3019_s21 = smov 0  }
  0x1c   :  { %s3021_s1 = smov 0   ;;  %s3023_s22 = smov 0  }
  0x1d LB: > { %3640 = sst [smem:[#allocation26_spill]] %s2886_s21  ;;  %s3609_s2 = sadd.s32 4294967295, %s2894_s22   ;;  %s2894_s22 = sphi %s3023_s22, %s39_s22   ;;  %s2890_s1 = sphi %s3021_s1, %s3681_s1   ;;  %s2886_s21 = sphi %s3019_s21, %s3680_s21   ;;  %s2882_s20 = sphi %s3017_s20, %s3679_s20   ;;  %s2878_s30 = sphi %s3015_s30, %s3678_s30   ;;  %s2874_s0 = sphi %s3013_s0, %s3677_s0  }
  0x1e   : > { %p2118_p0 = scmp.ge.s32.totalorder %s2894_s22, 1  ;;  %p3047_p1 = scmp.eq.s32.totalorder %s3609_s2, 0 }
  0x1f   : > { %p502_p2 = scmp.lt.s32.totalorder %s2894_s22, 3  ;;  %s2896_s25 = smov [#allocation7]  }
  0x20   : > { %s3641_s23 = scalar_select %p3047_p1, 1, 0 }
  0x21   : > { %p3052_p3 = pnand %p2118_p0, %p502_p2  ;;  %s514_s3 = sshll.u32 %s2896_s25, 4  ;;  %s3056_s3 = int_to_ptr.vmem [resolvable:$true] %s514_s3 }
  0x22   : > { %s2897_s27 = smov [#allocation10]   ;;  %s2898_s29 = smov [#allocation13]  }
  0x23   : > { %s3642_s24 = scalar_select %p3052_p3, 1, 0 }
  0x24   : > { %p2394_p4 = pneg %p3052_p3  ;;  %s544_s28 = sshll.u32 %s2897_s27, 4  ;;  %s3067_s28 = int_to_ptr.vmem [resolvable:$true] %s544_s28 }
  0x25   : > { %s3069_s2 = sshll.u32 %s2898_s29, 4  ;;  %s3644_s18 = sld [smem:[#allocation30_spill]]  ;;  %s569_s2 = int_to_ptr.vmem [resolvable:$true] %s3069_s2 }
  0x26   : > { %p3063_p6 = pnand %p2394_p4, %p3047_p1 }
  0x28   : > { %p3079_p8 = pneg %p3063_p6 }
  0x2b   : > { %s2542_s17 = scalar_lea.hbm %s3644_s18, 256 }
  0x2c   : > { %p2543_p7 = scmp.ne.s32.totalorder %s3644_s18, %s2542_s17  ;;  %p2549_p11 = scmp.lt.u32.totalorder %s2542_s17, %s3644_s18 }
  0x2e   : > { %p2545_p9 = pnand %p3079_p8, %p2543_p7 }
  0x30   : > { %p2546_p10 = pneg %p2545_p9 }
  0x32   : > { %p2551_p12 = pnand %p2549_p11, %p2546_p10 }
  0x34   : > { %2554 = shalt.err (!%p2551_p12)
}
  0x35   : > { %s2555_s14 = scalar_lea.vmem %s3056_s3, 256  ;;  %p2563_p4 = scmp.lt.s32.totalorder %s3056_s3, %s3056_s3 }
  0x36   : > { %p2556_p13 = scmp.ne.s32.totalorder %s3056_s3, %s2555_s14  ;;  %p2564_p5 = scmp.lt.s32.totalorder %s2555_s14, %s2555_s14 }
  0x38   : > { %p2558_p0 = pnand %p2556_p13, %p3079_p8  ;;  %p2565_p7 = por %p2564_p5, %p2563_p4 }
  0x3a   : > { %p2559_p2 = pneg %p2558_p0 }
  0x3c   : > { %p2566_p9 = pnand %p2565_p7, %p2559_p2 }
  0x3e   : > { %2569 = shalt.err (!%p2566_p9)
}
  0x3f   : > { %s3618_s16 = smov 64   ;;  %s2900_s17 = smov 4  }
  0x40   : > { %2397 = dma.hbm_to_vmem [thread:$0]  (!%p3063_p6), %s3644_s18, 256, %s3056_s3, [#allocation8], %s3618_s16, %s3618_s16, %s2900_s17  }
  0x41   : > { %s3646_s6 = sld [smem:[#allocation33_spill]] }
  0x47   : > { %s2570_s14 = scalar_lea.hbm %s3646_s6, 16 }
  0x48   : > { %p2571_p5 = scmp.ne.s32.totalorder %s3646_s6, %s2570_s14  ;;  %p2577_p12 = scmp.lt.u32.totalorder %s2570_s14, %s3646_s6 }
  0x4a   : > { %p2573_p10 = pnand %p2571_p5, %p3079_p8 }
  0x4c   : > { %p2574_p11 = pneg %p2573_p10 }
  0x4e   : > { %p2579_p13 = pnand %p2577_p12, %p2574_p11 }
  0x50   : > { %2582 = shalt.err (!%p2579_p13)
}
  0x51   : > { %s2583_s3 = scalar_lea.vmem %s3067_s28, 16  ;;  %s2590_s9 = scalar_lea.vmem %s3067_s28, 32 }
  0x52   : > { %p2584_p0 = scmp.ne.s32.totalorder %s3067_s28, %s2583_s3  ;;  %p2591_p7 = scmp.lt.s32.totalorder %s3067_s28, %s3067_s28 }
  0x53   : > { %p2592_p9 = scmp.lt.s32.totalorder %s2590_s9, %s2583_s3 }
  0x54   : > { %p2586_p2 = pnand %p2584_p0, %p3079_p8 }
  0x55   : > { %p2593_p5 = por %p2592_p9, %p2591_p7 }
  0x56   : > { %p2587_p4 = pneg %p2586_p2 }
  0x58   : > { %p2594_p10 = pnand %p2593_p5, %p2587_p4 }
  0x5a   : > { %2597 = shalt.err (!%p2594_p10)
}
  0x5b   : > { %2403 = dma.hbm_to_vmem [thread:$0]  (!%p3063_p6), %s3646_s6, 16, %s3067_s28, [#allocation11]  }
  0x5c   : > { %s3647_s8 = sld [smem:[#allocation35_spill]] }
  0x62   : > { %s2598_s25 = scalar_lea.hbm %s3647_s8, 16 }
  0x63   : > { %p2599_p11 = scmp.ne.s32.totalorder %s3647_s8, %s2598_s25  ;;  %p2605_p0 = scmp.lt.u32.totalorder %s2598_s25, %s3647_s8 }
  0x65   : > { %p2601_p12 = pnand %p2599_p11, %p3079_p8 }
  0x67   : > { %p2602_p13 = pneg %p2601_p12 }
  0x69   : > { %p2607_p2 = pnand %p2605_p0, %p2602_p13 }
  0x6b   : > { %2610 = shalt.err (!%p2607_p2)
}
  0x6c   : > { %s2611_s9 = scalar_lea.vmem %s569_s2, 16  ;;  %s2618_s28 = scalar_lea.vmem %s569_s2, 32 }
  0x6d   : > { %p2612_p4 = scmp.ne.s32.totalorder %s569_s2, %s2611_s9  ;;  %p2619_p5 = scmp.lt.s32.totalorder %s569_s2, %s569_s2 }
  0x6e   : > { %p2620_p10 = scmp.lt.s32.totalorder %s2618_s28, %s2611_s9 }
  0x6f   : > { %p2614_p7 = pnand %p2612_p4, %p3079_p8 }
  0x70   : > { %p2621_p3 = por %p2620_p10, %p2619_p5 }
  0x71   : > { %p2615_p9 = pneg %p2614_p7 }
  0x73   : > { %p2622_p1 = pnand %p2621_p3, %p2615_p9 }
  0x75   : > { %2625 = shalt.err (!%p2622_p1)
}
  0x76   : > { %2409 = dma.hbm_to_vmem [thread:$0]  (!%p3063_p6), %s3647_s8, 16, %s569_s2, [#allocation14]  }
  0x77   : > { %s2901_s21 = smov [#allocation16]   ;;  %s2902_s25 = smov [#allocation9]  }
  0x78   : > { %s593_s19 = sshll.u32 %s2901_s21, 4  ;;  %s530_s27 = sshll.u32 %s2902_s25, 4  ;;  %s594_s19 = int_to_ptr.vmem [resolvable:$true] %s593_s19  ;;  %s531_s27 = int_to_ptr.vmem [resolvable:$true] %s530_s27 }
  0x79   : > { %s2626_s3 = scalar_lea.hbm %s3598_s11, 16 }
  0x7a   : > { %p2627_p1 = scmp.ne.s32.totalorder %s3598_s11, %s2626_s3  ;;  %p2633_p12 = scmp.lt.u32.totalorder %s2626_s3, %s3598_s11 }
  0x7c   : > { %p2629_p3 = pnand %p2627_p1, %p3079_p8 }
  0x7e   : > { %p2630_p11 = pneg %p2629_p3 }
  0x80   : > { %p2635_p13 = pnand %p2633_p12, %p2630_p11 }
  0x82   : > { %2638 = shalt.err (!%p2635_p13)
}
  0x83   : > { %s2639_s2 = scalar_lea.vmem %s594_s19, 16  ;;  %s2646_s13 = scalar_lea.vmem %s594_s19, 32 }
  0x84   : > { %p2640_p0 = scmp.ne.s32.totalorder %s594_s19, %s2639_s2  ;;  %p2647_p7 = scmp.lt.s32.totalorder %s594_s19, %s594_s19 }
  0x85   : > { %p2648_p9 = scmp.lt.s32.totalorder %s2646_s13, %s2639_s2 }
  0x86   : > { %p2642_p2 = pnand %p2640_p0, %p3079_p8 }
  0x87   : > { %p2649_p5 = por %p2648_p9, %p2647_p7 }
  0x88   : > { %p2643_p4 = pneg %p2642_p2 }
  0x8a   : > { %p2650_p10 = pnand %p2649_p5, %p2643_p4 }
  0x8c   : > { %2653 = shalt.err (!%p2650_p10)
}
  0x8d   : > { %2415 = dma.hbm_to_vmem [thread:$0]  (!%p3063_p6), %s3598_s11, 16, %s594_s19, [#allocation17]  }
  0x8e   : > { %s3648_s5 = sld [smem:[#allocation32_spill]] }
  0x94   : > { %s2654_s14 = scalar_lea.hbm %s3648_s5, 256 }
  0x95   : > { %p2655_p1 = scmp.ne.s32.totalorder %s3648_s5, %s2654_s14  ;;  %p2661_p12 = scmp.lt.u32.totalorder %s2654_s14, %s3648_s5 }
  0x97   : > { %p2657_p3 = pnand %p2655_p1, %p3079_p8 }
  0x99   : > { %p2658_p11 = pneg %p2657_p3 }
  0x9b   : > { %p2663_p13 = pnand %p2661_p12, %p2658_p11 }
  0x9d   : > { %2666 = shalt.err (!%p2663_p13)
}
  0x9e   : > { %s2667_s2 = scalar_lea.vmem %s531_s27, 256  ;;  %p2675_p7 = scmp.lt.s32.totalorder %s531_s27, %s531_s27 }
  0x9f   : > { %p2668_p0 = scmp.ne.s32.totalorder %s531_s27, %s2667_s2  ;;  %p2676_p9 = scmp.lt.s32.totalorder %s2667_s2, %s2667_s2 }
  0xa1   : > { %p2670_p2 = pnand %p2668_p0, %p3079_p8  ;;  %p2677_p5 = por %p2676_p9, %p2675_p7 }
  0xa3   : > { %p2671_p4 = pneg %p2670_p2 }
  0xa5   : > { %p2678_p10 = pnand %p2677_p5, %p2671_p4 }
  0xa7   : > { %2681 = shalt.err (!%p2678_p10)
}
  0xa8   : > { %s3649_s19 = smov 64   ;;  %s2903_s25 = smov [#allocation12]  }
  0xa9   : > { %2400 = dma.hbm_to_vmem [thread:$0]  (!%p3063_p6), %s3648_s5, 256, %s531_s27, [#allocation8], %s3649_s19, %s3649_s19, %s2900_s17  }
  0xaa   : > { %s554_s16 = sshll.u32 %s2903_s25, 4  ;;  %s2904_s29 = smov [#allocation15]   ;;  %s555_s16 = int_to_ptr.vmem [resolvable:$true] %s554_s16 }
  0xab   : > { %s582_s14 = sshll.u32 %s2904_s29, 4  ;;  %s3650_s7 = sld [smem:[#allocation34_spill]]  ;;  %s583_s14 = int_to_ptr.vmem [resolvable:$true] %s582_s14 }
  0xb1   : > { %s2682_s28 = scalar_lea.hbm %s3650_s7, 256 }
  0xb2   : > { %p2683_p1 = scmp.ne.s32.totalorder %s3650_s7, %s2682_s28  ;;  %p2689_p12 = scmp.lt.u32.totalorder %s2682_s28, %s3650_s7 }
  0xb4   : > { %p2685_p3 = pnand %p2683_p1, %p3079_p8 }
  0xb6   : > { %p2686_p11 = pneg %p2685_p3 }
  0xb8   : > { %p2691_p13 = pnand %p2689_p12, %p2686_p11 }
  0xba   : > { %2694 = shalt.err (!%p2691_p13)
}
  0xbb   : > { %s2695_s27 = scalar_lea.vmem %s555_s16, 256  ;;  %p2703_p7 = scmp.lt.s32.totalorder %s555_s16, %s555_s16 }
  0xbc   : > { %p2696_p0 = scmp.ne.s32.totalorder %s555_s16, %s2695_s27  ;;  %p2704_p9 = scmp.lt.s32.totalorder %s2695_s27, %s2695_s27 }
  0xbe   : > { %p2698_p2 = pnand %p2696_p0, %p3079_p8  ;;  %p2705_p5 = por %p2704_p9, %p2703_p7 }
  0xc0   : > { %p2699_p4 = pneg %p2698_p2 }
  0xc2   : > { %p2706_p10 = pnand %p2705_p5, %p2699_p4 }
  0xc4   : > { %2709 = shalt.err (!%p2706_p10)
}
  0xc5   : > { %2406 = dma.hbm_to_vmem [thread:$0]  (!%p3063_p6), %s3650_s7, 256, %s555_s16, [#allocation11], %s3649_s19, %s3649_s19, %s2900_s17  }
  0xc6   : > { %s3651_s10 = sld [smem:[#allocation37_spill]] }
  0xcc   : > { %s2710_s3 = scalar_lea.hbm %s3651_s10, 16 }
  0xcd   : > { %p2711_p1 = scmp.ne.s32.totalorder %s3651_s10, %s2710_s3  ;;  %p2717_p12 = scmp.lt.u32.totalorder %s2710_s3, %s3651_s10 }
  0xcf   : > { %p2713_p3 = pnand %p2711_p1, %p3079_p8 }
  0xd1   : > { %p2714_p11 = pneg %p2713_p3 }
  0xd3   : > { %p2719_p13 = pnand %p2717_p12, %p2714_p11 }
  0xd5   : > { %2722 = shalt.err (!%p2719_p13)
}
  0xd6   : > { %s2723_s13 = scalar_lea.vmem %s583_s14, 16  ;;  %s2730_s17 = scalar_lea.vmem %s583_s14, 32 }
  0xd7   : > { %p2724_p0 = scmp.ne.s32.totalorder %s583_s14, %s2723_s13  ;;  %p2731_p7 = scmp.lt.s32.totalorder %s583_s14, %s583_s14 }
  0xd8   : > { %p2732_p9 = scmp.lt.s32.totalorder %s2730_s17, %s2723_s13 }
  0xd9   : > { %p2726_p2 = pnand %p2724_p0, %p3079_p8 }
  0xda   : > { %p2733_p5 = por %p2732_p9, %p2731_p7 }
  0xdb   : > { %p2727_p4 = pneg %p2726_p2 }
  0xdd   : > { %p2734_p10 = pnand %p2733_p5, %p2727_p4 }
  0xdf   : > { %2737 = shalt.err (!%p2734_p10)
}
  0xe0   : > { %2412 = dma.hbm_to_vmem [thread:$0]  (!%p3063_p6), %s3651_s10, 16, %s583_s14, [#allocation14]  }
  0xe1   : > { %s2905_s27 = smov [#allocation18]   ;;  %s2738_s29 = scalar_lea.hbm %s3599_s12, 16 }
  0xe2   : > { %s604_s6 = sshll.u32 %s2905_s27, 4  ;;  %p2739_p1 = scmp.ne.s32.totalorder %s3599_s12, %s2738_s29  ;;  %s605_s6 = int_to_ptr.vmem [resolvable:$true] %s604_s6 }
  0xe3   : > { %p2745_p12 = scmp.lt.u32.totalorder %s2738_s29, %s3599_s12 }
  0xe4   : > { %p2741_p3 = pnand %p2739_p1, %p3079_p8 }
  0xe6   : > { %p2742_p11 = pneg %p2741_p3 }
  0xe8   : > { %p2747_p13 = pnand %p2745_p12, %p2742_p11 }
  0xea   : > { %2750 = shalt.err (!%p2747_p13)
}
  0xeb   : > { %s2751_s14 = scalar_lea.vmem %s605_s6, 16  ;;  %s2758_s2 = scalar_lea.vmem %s605_s6, 32 }
  0xec   : > { %p2752_p0 = scmp.ne.s32.totalorder %s605_s6, %s2751_s14  ;;  %p2759_p7 = scmp.lt.s32.totalorder %s605_s6, %s605_s6 }
  0xed   : > { %p2760_p9 = scmp.lt.s32.totalorder %s2758_s2, %s2751_s14 }
  0xee   : > { %p2754_p2 = pnand %p2752_p0, %p3079_p8 }
  0xef   : > { %p2761_p5 = por %p2760_p9, %p2759_p7 }
  0xf0   : > { %p2755_p4 = pneg %p2754_p2 }
  0xf2   : > { %p2762_p10 = pnand %p2761_p5, %p2755_p4 }
  0xf4   : > { %2765 = shalt.err (!%p2762_p10)
}
  0xf5   : > { %2418 = dma.hbm_to_vmem [thread:$0]  (!%p3063_p6), %s3599_s12, 16, %s605_s6, [#allocation17]  }
  0xf6   : > { %s2117_s15 = sadd.s32 4294967294, %s2894_s22   ;;  %s51_s19 = sadd.s32 1, %s2890_s1 }
  0xf7   : > { %p53_p8 = scmp.ge.s32.totalorder %s51_s19, 2  ;;  %s86_s26 = sadd.s32 1, %s2882_s20 }
  0xf8   : > { %p93_p1 = scmp.ne.s32.totalorder %s2882_s20, %s2878_s30  ;;  %p94_p3 = scmp.eq.s32.totalorder %s2894_s22, 0 }
  0xf9   : > { %s3683_s19 = smov (%p53_p8, %s51_s19), 0  ;;  %p99_p12 = scmp.ne.s32.totalorder %s2878_s30, %s2874_s0 }
  0xfa   : > { %p3250_p11 = por %p94_p3, %p93_p1  ;;  %s81_s27 = ssub.s32 %s2890_s1, %s3683_s19 }
  0xfb   : > { %s3653_s6 = sadd.s32 4294967295, %s2894_s22   ;;  %p84_p13 = scmp.eq.s32.totalorder %s81_s27, 0 }
  0xfc   : > { %p489_p6 = scmp.eq.s32.totalorder %s3653_s6, 1  ;;  %p3654_p0 = scmp.ne.s32.totalorder %s3641_s23, 0 }
  0xfd   : > { %p495_p7 = scmp.eq.s32.totalorder %s2117_s15, 1  ;;  %p2435_p5 = scmp.lt.s32.totalorder %s2894_s22, 2 }
  0xfe   : > { %p3262_p2 = por %p3654_p0, %p99_p12  ;;  %p3266_p4 = por %p489_p6, %p93_p1 }
  0xff   : > { %s3271_s29 = scalar_select %p84_p13, %s2882_s20, %s86_s26  }
 0x100   : > { %s3656_s25 = scalar_select %p3266_p4, 1, 0 }
 0x101   : > { %p3273_p9 = por %p495_p7, %p99_p12  ;;  %s640_s9 = sand.u32 1, %s2882_s20  }
 0x102   : > { %s2129_s28 = sshll.u32 %s2890_s1, 7  ;;  %s2128_s4 = sshll.u32 %s640_s9, 3 }
 0x103   : > { %s3657_s3 = scalar_select %p3273_p9, 1, 0 }
 0x104   : > { %s3658_s13 = sld [smem:[#allocation28_spill]]  ;;  %s644_s15 = scalar_lea.vmem [#allocation4], %s2128_s4 }
 0x105   : > { %s652_s26 = sshll.u32 %s644_s15, 4  ;;  %p3287_p10 = pnand %p2435_p5, %p3250_p11  ;;  %s3291_s26 = int_to_ptr.vmem [resolvable:$true] %s652_s26 }
 0x106   : > { %s641_s6 = scalar_lea.sflag [#allocation5], %s640_s9 }
 0x107   : > { %p2768_p1 = pneg %p3287_p10 }
 0x10a   : > { %s3283_s17 = scalar_lea.hbm %s3658_s13, %s2129_s28  ;;  %s2771_s16 = scalar_lea.hbm %s3658_s13, 256 }
 0x10b   : > { %s2766_s5 = scalar_lea.hbm %s3283_s17, 128  ;;  %p2772_p11 = scmp.lt.u32.totalorder %s3283_s17, %s3658_s13 }
 0x10c   : > { %p2767_p8 = scmp.ne.s32.totalorder %s3283_s17, %s2766_s5  ;;  %p2773_p6 = scmp.lt.u32.totalorder %s2771_s16, %s2766_s5 }
 0x10d   : > { %p2775_p0 = scmp.lt.u32.totalorder %s2766_s5, %s3283_s17 }
 0x10e   : > { %p2769_p3 = pnand %p2768_p1, %p2767_p8  ;;  %p2774_p13 = por %p2773_p6, %p2772_p11 }
 0x110   : > { %p2770_p12 = pneg %p2769_p3  ;;  %p2776_p7 = por %p2775_p0, %p2774_p13 }
 0x112   : > { %p2777_p5 = pnand %p2776_p7, %p2770_p12 }
 0x114   : > { %2780 = shalt.err (!%p2777_p5)
}
 0x115   : > { %s2781_s9 = scalar_lea.vmem %s3291_s26, 128  ;;  %s2906_s15 = smov [#allocation4]  }
 0x116   : > { %p2782_p8 = scmp.ne.s32.totalorder %s3291_s26, %s2781_s9  ;;  %s2786_s28 = sshll.u32 %s2906_s15, 4  ;;  %s2787_s28 = int_to_ptr.vmem [resolvable:$false] %s2786_s28 }
 0x117   : > { %s2788_s4 = scalar_lea.vmem %s2787_s28, 256  ;;  %p2789_p4 = scmp.lt.s32.totalorder %s3291_s26, %s2787_s28 }
 0x118   : > { %p2784_p3 = pnand %p2782_p8, %p2768_p1  ;;  %p2790_p11 = scmp.lt.s32.totalorder %s2788_s4, %s2781_s9 }
 0x11a   : > { %p2785_p9 = pneg %p2784_p3  ;;  %p2791_p6 = por %p2790_p11, %p2789_p4 }
 0x11c   : > { %p2792_p13 = pnand %p2791_p6, %p2785_p9 }
 0x11e   : > { %2795 = shalt.err (!%p2792_p13)
}
 0x11f   : > { %2422 = dma.hbm_to_vmem [thread:$0]  (!%p3287_p10), %s3283_s17, 128, %s3291_s26, %s641_s6  }
 0x120   : > { %p3660_p12 = scmp.ne.s32.totalorder %s3642_s24, 0 }
 0x121   : > { %s3321_s5 = sand.u32 (!%p3660_p12), 1, %s2878_s30  }
 0x122   : > { %672 = sbr.rel (%p3660_p12) target bundleno = 2578 (0xa12), region = 96  ;;  %s2131_s16 = sshll.u32 (!%p3660_p12), %s3321_s5, 3 }
 0x123   : > { %s675_s14 = scalar_lea.sflag (!%p3660_p12), [#allocation5], %s3321_s5  ;;  %s678_s2 = scalar_lea.vmem (!%p3660_p12), [#allocation4], %s2131_s16 }
 0x129   : > { %2849 = dma.done.wait (%p3262_p2), %s675_s14, 128  }
 0x12a   : > { %2851 = vsyncadd (%p3262_p2), %s675_s14, 4294967168  ;;  %p3661_p4 = scmp.ne.s32.totalorder %s3641_s23, 0 }
 0x12c   : > { %2853 = dma.done.wait (%p3661_p4), [#allocation8], 512  }
 0x12d   : > { %2855 = vsyncadd (%p3661_p4), [#allocation8], 4294966784 }
 0x12e   : > { %2857 = dma.done.wait (%p3661_p4), [#allocation11], 272  }
 0x12f   : > { %2859 = vsyncadd (%p3661_p4), [#allocation11], 4294967024 }
 0x130   : > { %2861 = dma.done.wait (%p3661_p4), [#allocation14], 32  }
 0x131   : > { %2863 = vsyncadd (%p3661_p4), [#allocation14], 4294967264 }
 0x132   : > { %2865 = dma.done.wait (%p3661_p4), [#allocation17], 32  }
 0x133   : > { %2867 = vsyncadd (%p3661_p4), [#allocation17], 4294967264  ;;  %s3662_s24 = sld [smem:[#allocation26_spill]]  ;;  %v2907_v0 = vmov 0.0   ;;  %vm2908_vm0 = vmmov 0   ;;  %s3663_s27 = sld [smem:[#allocation27_spill]] }
 0x134   : > { %2242 = vmatprep.subr.bf16.mxu1 %v2907_v0  ;;  %2246 = vmatprep.mubr.msk.bf16.mxu1 %vm2908_vm0, %v2907_v0  ;;  %v2508_v1 = vld [vmem:[#allocation9] sm:$0xff]   ;;  %v2509_v2 = vld [vmem:[#allocation9 + $0x8] sm:$0xff]   ;;  %v2510_v4 = vld [vmem:[#allocation7] sm:$0xff]   ;;  %vm821_vm1 = vcmask 261120   ;;  %s3664_s28 = sld [smem:[#allocation31_spill]]  ;;  %vm930_vm2 = vcmask 60416  }
 0x135   : > { %2258 = vmatprep.subr.bf16.mxu0 %v2907_v0  ;;  %2262 = vmatprep.mubr.msk.bf16.mxu0 %vm2908_vm0, %v2907_v0  ;;  %v2511_v5 = vld [vmem:[#allocation7 + $0x8] sm:$0xff]   ;;  %v3362_v6 = vld [vmem:[%s678_s2] sm:$0xff]  ;;  %v2144_v11 = vld [vmem:[#allocation10] ss:$0 sm:$0xff]  ;;  %s2909_s4 = smov 104   ;;  %s2910_s14 = smov 120  }
 0x136   : > { %2243 = vmatpush3.bf16.msra.mxu1 %v2508_v1  ;;  %2259 = vmatpush3.bf16.msra.mxu0 %v2510_v4  ;;  %v970_v8 = vpack.c.bf16 %v3362_v6, %v3362_v6  ;;  %v2512_v9 = vld [vmem:[#allocation12] sm:$0xff]   ;;  %v2513_v10 = vld [vmem:[#allocation12 + $0x8] sm:$0xff]   ;;  %s2911_s2 = smov 112   ;;  %vm1063_vm3 = vcmask 64512   ;;  %v2148_v28 = vld [vmem:[#allocation13] ss:$0 sm:$0xff] }
 0x137   : > { %2244 = vmatprep.subr.bf16.mxu1 %v2907_v0  ;;  %2260 = vmatprep.subr.bf16.mxu0 %v2907_v0  ;;  %vm1299_vm4 = vcmask 1043456   ;;  %s3666_s15 = sld [smem:[#allocation36_spill]]  ;;  %vm1840_vm5 = vcmask 523264   ;;  %s3670_s17 = sld [smem:[#allocation41_spill]] }
 0x138   : > { %s3673_s8 = sld [smem:[#allocation44_spill]]  ;;  %s1916_s26 = scalar_lea.sflag [#allocation6], %s3321_s5 }
 0x139   : > { %p777_p2 = scmp.lt.s32.totalorder %s3662_s24, 1  ;;  %p3674_p10 = scmp.ne.s32.totalorder %s3656_s25, 0 }
 0x13a   : > { %2245 = vmatpush3.bf16.msra.mxu1 %v2509_v2  ;;  %2261 = vmatpush3.bf16.msra.mxu0 %v2511_v5  ;;  %v2154_v15 = vld [vmem:[%s3664_s28] ss:$0 sm:$0xff] }
 0x13b   : > { %s3352_s21 = scalar_select %p777_p2, %s3662_s24, 1  ;;  %2250 = vmatprep.subr.bf16.mxu1 %v2907_v0  ;;  %2272 = vmatprep.subr.bf16.mxu0 %v2907_v0 }
 0x13d   : > { %s2141_s23 = sshll.u32 %s3352_s21, 3  ;;  %2263 = vmatmul.mubr.msk.bf16.vlgmr.msra.gmra.mrb[0].mxu0 %vm821_vm1, %v970_v8 }
 0x13e   : > { %s780_s6 = scalar_lea.vmem %s3663_s27, %s2141_s23  ;;  %2274 = vmatprep.mubr.msk.bf16.mxu0 %vm2908_vm0, %v2907_v0  ;;  %s2189_s23 = sshll.u32 %s3352_s21, 4 }
 0x13f   : > { %v796_v3 = vld [vmem:[%s780_s6] sm:$0xff]  ;;  %s3665_s27 = sld [smem:[#allocation29_spill]]  ;;  %s3671_s21 = sld [smem:[#allocation42_spill]] }
 0x140   : > { %v797_v7 = vpack.c.bf16 %v796_v3, %v796_v3 }
 0x142   : > { %2247 = vmatmul.mubr.msk.bf16.vlgmr.msra.gmra.mrb[0].mxu1 %vm821_vm1, %v797_v7 }
 0x143   : > { %2254 = vmatprep.mubr.msk.bf16.mxu1 %vm2908_vm0, %v2907_v0  ;;  %2251 = vmatpush3.bf16.msra.mxu1 %v2512_v9 }
 0x144   : > { %2252 = vmatprep.subr.bf16.mxu1 %v2907_v0 }
 0x145   : > { %s788_s6 = scalar_lea.vmem %s3665_s27, %s2189_s23  ;;  %s776_s23 = scalar_lea.vmem [#allocation19], %s2131_s16 }
 0x146   : > { %v2193_v49 = vld [vmem:[%s788_s6] sm:$0xff]   ;;  %v2200_v61 = vld [vmem:[%s788_s6 + $0x8] sm:$0xff]   ;;  %s3667_s6 = sld [smem:[#allocation38_spill]]  ;;  %s2912_s16 = smov [#allocation19]  }
 0x147   : > { %2253 = vmatpush3.bf16.msra.mxu1 %v2513_v10  ;;  %v2194_v50 = vunpack.c.l.bf16 %v2193_v49  ;;  %v2195_v60 = vunpack.c.h.bf16 %v2193_v49  ;;  %v2198_v2 = vunpack.c.l.bf16 %v2200_v61  ;;  %v2199_v10 = vunpack.c.h.bf16 %v2200_v61  ;;  %v1495_v61 = vld [vmem:[%s3666_s15 + $0x8] sm:$0xf] }
 0x148   : > { %2266 = vmatprep.subr.bf16.mxu1 %v2907_v0 }
 0x14a   : > { %2255 = vmatmul.mubr.msk.bf16.vlgmr.msra.gmra.mrb[4].mxu1 %vm821_vm1, %v797_v7 }
 0x14b   : > { %2268 = vmatprep.mubr.msk.bf16.mxu1 %vm2908_vm0, %v2907_v0 }
 0x210   : > { %v1032_v19 = vpop.f32.mrb[0].mxu0 }
 0x211   : > { %v1033_v20 = vadd.f32 %v2154_v15, %v1032_v19  ;;  %v2264_v21 = vpop.f32.mrb[1].mxu0 }
 0x212   : > { %v1035_v22 = vpop.f32.mrb[2].mxu0 }
 0x213   : > { %v1038_v23 = vmul.f32 0.35355338, %v1033_v20  ;;  %v2265_v24 = vpop.f32.mrb[3].mxu0 }
 0x215   : > { %v859_v12 = vpop.f32.mrb[0].mxu1  ;;  %v1039_v25 = vpack.c.bf16 %v1038_v23, %v1038_v23 }
 0x216   : > { %v860_v13 = vadd.f32 %v2144_v11, %v859_v12  ;;  %v2248_v14 = vpop.f32.mrb[1].mxu1 }
 0x217   : > { %v862_v16 = vpop.f32.mrb[2].mxu1 }
 0x218   : > { %v928_v17 = vpack.c.bf16 %v860_v13, %v860_v13  ;;  %v2249_v18 = vpop.f32.mrb[3].mxu1 }
 0x21a   : > { %931 = vst.msk [vmem:[#allocation2] sm:$0xf] %vm930_vm2, %v928_v17  ;;  %959 = vrot.lane.b32.xlu1 %v928_v17, %s2909_s4  ;;  %936 = vrot.lane.b32.xlu0 %v928_v17, %s2910_s14 }
 0x21d   : > { %v922_v29 = vpop.f32.mrb[4].mxu1 }
 0x21e   : > { %949 = vrot.lane.b32.xlu0 %v928_v17, %s2911_s2  ;;  %1041 = vrot.lane.b32.xlu1 %v1039_v25, %s2910_s14  ;;  %v923_v30 = vadd.f32 %v2148_v28, %v922_v29  ;;  %v2256_v31 = vpop.f32.mrb[5].mxu1 }
 0x21f   : > { %v925_v32 = vpop.f32.mrb[6].mxu1 }
 0x220   : > { %v3393_v33 = vpack.c.bf16 %v923_v30, %v923_v30  ;;  %v2257_v34 = vpop.f32.mrb[7].mxu1 }
 0x221   : > { %v1047_v26 = vld [vmem:[#allocation2] sm:$0xf] }
 0x222   : > { %v1068_v27 = vsel %vm1063_vm3, %v1047_v26, 0  ;;  %1043 = vrot.lane.b32.xlu0 %v1039_v25, %s2911_s2  ;;  %1045 = vrot.lane.b32.xlu1 %v1039_v25, %s2909_s4  ;;  %932 = vst.msk [vmem:[#allocation3] sm:$0xf] %vm930_vm2, %v3393_v33 }
 0x223   : > { %2267 = vmatpush3.bf16.xpose.msra.mxu1 %v1068_v27 }
 0x224   : > { %2278 = vmatprep.subr.bf16.mxu1 %v2907_v0 }
 0x226   : > { %944 = vrot.lane.b32.xlu1 %v3393_v33, %s2910_s14  ;;  %s3668_s14 = sld [smem:[#allocation40_spill]] }
 0x229   : > { %v1051_v44 = vld [vmem:[#allocation3] sm:$0xf] }
 0x22a   : > { %2269 = vmatmul.mubr.msk.bf16.vlgmr.msra.gmra.mrb[8].mxu1 %vm1063_vm3, %v1039_v25  ;;  %v1301_v46 = vsel %vm1299_vm4, %v1051_v44, 0 }
 0x22b   : > { %2280 = vmatprep.mubr.msk.bf16.mxu1 %vm2908_vm0, %v2907_v0 }
 0x28c   : > { %v960_v35 = vpop.permute.xlu1 %959  ;;  %v937_v36 = vpop.permute.xlu0 %936 }
 0x28d   : > { %963 = vst.msk [vmem:[#allocation2 + $0xc] sm:$0xf] %vm930_vm2, %v960_v35  ;;  %940 = vst.msk [vmem:[#allocation2 + $0x4] sm:$0xf] %vm930_vm2, %v937_v36 }
 0x290   : > { %v950_v37 = vpop.permute.xlu0 %949  ;;  %v1042_v43 = vpop.permute.xlu1 %1041 }
 0x291   : > { %953 = vst.msk [vmem:[#allocation2 + $0x8] sm:$0xf] %vm930_vm2, %v950_v37 }
 0x294   : > { %v1048_v38 = vld [vmem:[#allocation2 + $0x4] sm:$0xf]  ;;  %v1050_v42 = vld [vmem:[#allocation2 + $0xc] sm:$0xf]  ;;  %v1044_v47 = vpop.permute.xlu0 %1043  ;;  %v1046_v48 = vpop.permute.xlu1 %1045 }
 0x295   : > { %v1114_v39 = vsel %vm1063_vm3, %v1048_v38, 0  ;;  %v1206_v45 = vsel %vm1063_vm3, %v1050_v42, 0 }
 0x296   : > { %2273 = vmatpush3.bf16.xpose.msra.mxu0 %v1114_v39 }
 0x297   : > { %2284 = vmatprep.subr.bf16.mxu0 %v2907_v0 }
 0x298   : > { %v1049_v40 = vld [vmem:[#allocation2 + $0x8] sm:$0xf]  ;;  %v945_v57 = vpop.permute.xlu1 %944 }
 0x299   : > { %v1160_v41 = vsel %vm1063_vm3, %v1049_v40, 0  ;;  %948 = vst.msk [vmem:[#allocation3 + $0x4] sm:$0xf] %vm930_vm2, %v945_v57  ;;  %v1494_v57 = vld [vmem:[%s3666_s15 + $0x4] sm:$0xf] }
 0x29a   : > { %2279 = vmatpush3.bf16.xpose.msra.mxu1 %v1160_v41 }
 0x29b   : > { %2290 = vmatprep.subr.bf16.mxu1 %v2907_v0 }
 0x29d   : > { %2275 = vmatmul.mubr.msk.bf16.vlgmr.msra.gmra.mrb[4].mxu0 %vm1063_vm3, %v1042_v43 }
 0x29e   : > { %2285 = vmatpush3.bf16.xpose.msra.mxu0 %v1206_v45  ;;  %2286 = vmatprep.mubr.msk.bf16.mxu0 %vm2908_vm0, %v2907_v0 }
 0x29f   : > { %2296 = vmatprep.subr.bf16.mxu0 %v2907_v0 }
 0x2a0   : > { %v1052_v58 = vld [vmem:[#allocation3 + $0x4] sm:$0xf] }
 0x2a1   : > { %2281 = vmatmul.mubr.msk.bf16.vlgmr.msra.gmra.mrb[12].mxu1 %vm1063_vm3, %v1044_v47  ;;  %v1347_v59 = vsel %vm1299_vm4, %v1052_v58, 0  ;;  %v1547_v58 = vsel %vm1299_vm4, %v1494_v57, 0 }
 0x2a2   : > { %2291 = vmatpush3.bf16.msra.mxu1 %v1301_v46  ;;  %2292 = vmatprep.mubr.msk.bf16.mxu1 %vm2908_vm0, %v2907_v0  ;;  %v1493_v46 = vld [vmem:[%s3666_s15] sm:$0xf] }
 0x2a3   : > { %2302 = vmatprep.subr.bf16.mxu1 %v2907_v0 }
 0x2a5   : > { %2287 = vmatmul.mubr.msk.bf16.vlgmr.msra.gmra.mrb[8].mxu0 %vm1063_vm3, %v1046_v48 }
 0x2a6   : > { %2298 = vmatprep.mubr.msk.bf16.mxu0 %vm2908_vm0, %v2907_v0  ;;  %2297 = vmatpush3.bf16.msra.mxu0 %v1347_v59 }
 0x2a7   : > { %2308 = vmatprep.subr.bf16.mxu0 %v2907_v0 }
 0x2fd   : > { %v1104_v51 = vpop.f32.mrb[8].mxu1 }
 0x2fe   : > { %v1105_v52 = vadd.f32 %v2194_v50, %v1104_v51  ;;  %v2270_v53 = vpop.f32.mrb[9].mxu1  ;;  %v1501_v51 = vsel %vm1299_vm4, %v1493_v46, 0 }
 0x2ff   : > { %v1107_v54 = vpop.f32.mrb[10].mxu1 }
 0x300   : > { %v2271_v55 = vpop.f32.mrb[11].mxu1  ;;  %v1248_v56 = vsel %vm1063_vm3, %v1105_v52, -inf }
 0x301   : > { %1249 = vmax.xlane.f32.xlu0 %v1248_v56 }
 0x370   : > { %v1150_v62 = vpop.f32.mrb[4].mxu0 }
 0x371   : > { %v1151_v63 = vadd.f32 %v2195_v60, %v1150_v62  ;;  %v2276_v1 = vpop.f32.mrb[5].mxu0 }
 0x372   : > { %v1153_v3 = vpop.f32.mrb[6].mxu0 }
 0x373   : > { %v2277_v4 = vpop.f32.mrb[7].mxu0  ;;  %v1251_v5 = vsel %vm1063_vm3, %v1151_v63, -inf }
 0x374   : > { %1252 = vmax.xlane.f32.xlu1 %v1251_v5  ;;  %v1196_v7 = vpop.f32.mrb[12].mxu1  ;;  %v1593_v4 = vsel %vm1299_vm4, %v1495_v61, 0 }
 0x375   : > { %v1197_v8 = vadd.f32 %v2198_v2, %v1196_v7  ;;  %v2282_v9 = vpop.f32.mrb[13].mxu1 }
 0x376   : > { %v1199_v11 = vpop.f32.mrb[14].mxu1 }
 0x377   : > { %v2283_v12 = vpop.f32.mrb[15].mxu1  ;;  %v1254_v13 = vsel %vm1063_vm3, %v1197_v8, -inf  ;;  %v1496_v11 = vld [vmem:[%s3666_s15 + $0xc] sm:$0xf] }
 0x378   : > { %v1242_v14 = vpop.f32.mrb[8].mxu0  ;;  %1255 = vmax.xlane.f32.xlu0 %v1254_v13 }
 0x379   : > { %v1243_v15 = vadd.f32 %v2199_v10, %v1242_v14  ;;  %v2288_v16 = vpop.f32.mrb[9].mxu0 }
 0x37a   : > { %v1245_v17 = vpop.f32.mrb[10].mxu0 }
 0x37b   : > { %v2289_v18 = vpop.f32.mrb[11].mxu0  ;;  %v1257_v19 = vsel %vm1063_vm3, %v1243_v15, -inf  ;;  %v1639_v17 = vsel %vm1299_vm4, %v1496_v11, 0 }
 0x37c   : > { %1258 = vmax.xlane.f32.xlu0 %v1257_v19 }
 0x385   : > { %964 = vrot.lane.b32.xlu1 %v3393_v33, %s2909_s4  ;;  %s3669_s4 = sld [smem:[#allocation39_spill]] }
 0x38e   : > { %v1250_v20 = vpop.xlane.xlu0 %1249 }
 0x38f   : > { %v1260_v21 = vsub.f32 %v1105_v52, %v1250_v20 }
 0x391   : > { %v1264_v22 = vpack.c.bf16 %v1260_v21, %v1260_v21 }
 0x392   : > { %954 = vrot.lane.b32.xlu0 %v3393_v33, %s2911_s2  ;;  %s2186_s2 = sshll.u32 %s3662_s24, 7  ;;  %s2800_s24 = sshll.u32 %s2912_s16, 4  ;;  %s2801_s24 = int_to_ptr.vmem [resolvable:$false] %s2800_s24 }
 0x393   : > { %v1269_v23 = vmul.bf16 1069105081, %v1264_v22  ;;  %s3537_s10 = scalar_lea.hbm %s3673_s8, %s2186_s2 }
 0x395   : > { %2520 = vpow.bf16 %v1269_v23 }
 0x3a0   : > { %v2521_v24 = vpop.eup %2520 }
 0x3a1   : > { %2293 = vmatmul.mubr.msk.bf16.vlgmr.msra.gmra.mrb[16].mxu1 %vm1063_vm3, %v2521_v24  ;;  %v1280_v25 = vunpack.c.l.bf16 %v2521_v24 }
 0x3a2   : > { %2304 = vmatprep.mubr.msk.bf16.mxu1 %vm2908_vm0, %v2907_v0 }
 0x3a3   : > { %v1284_v26 = vsel %vm1063_vm3, %v1280_v25, 0.0 }
 0x3a9   : > { %1285 = vadd.xlane.f32.xlu1 %v1284_v26 }
 0x401   : > { %v1253_v27 = vpop.xlane.xlu1 %1252 }
 0x402   : > { %v1261_v28 = vsub.f32 %v1151_v63, %v1253_v27 }
 0x404   : > { %v1265_v29 = vpack.c.bf16 %v1261_v28, %v1261_v28 }
 0x405   : > { %v965_v30 = vpop.permute.xlu1 %964  ;;  %v1256_v31 = vpop.xlane.xlu0 %1255 }
 0x406   : > { %v1272_v32 = vmul.bf16 1069105081, %v1265_v29  ;;  %968 = vst.msk [vmem:[#allocation3 + $0xc] sm:$0xf] %vm930_vm2, %v965_v30  ;;  %v1262_v33 = vsub.f32 %v1197_v8, %v1256_v31 }
 0x408   : > { %2522 = vpow.bf16 %v1272_v32  ;;  %v1266_v34 = vpack.c.bf16 %v1262_v33, %v1262_v33 }
 0x409   : > { %v1259_v35 = vpop.xlane.xlu0 %1258 }
 0x40a   : > { %v1275_v36 = vmul.bf16 1069105081, %v1266_v34  ;;  %v1263_v37 = vsub.f32 %v1243_v15, %v1259_v35 }
 0x40c   : > { %2524 = vpow.bf16 %v1275_v36  ;;  %v1267_v38 = vpack.c.bf16 %v1263_v37, %v1263_v37 }
 0x40d   : > { %v955_v39 = vpop.permute.xlu0 %954  ;;  %v1054_v41 = vld [vmem:[#allocation3 + $0xc] sm:$0xf] }
 0x40e   : > { %v1278_v40 = vmul.bf16 1069105081, %v1267_v38  ;;  %958 = vst.msk [vmem:[#allocation3 + $0x8] sm:$0xf] %vm930_vm2, %v955_v39  ;;  %v1439_v43 = vsel %vm1299_vm4, %v1054_v41, 0 }
 0x410   : > { %2526 = vpow.bf16 %v1278_v40 }
 0x413   : > { %v2523_v42 = vpop.eup %2522 }
 0x414   : > { %2299 = vmatmul.mubr.msk.bf16.vlgmr.msra.gmra.mrb[12].mxu0 %vm1063_vm3, %v2523_v42  ;;  %v1281_v44 = vunpack.c.l.bf16 %v2523_v42 }
 0x415   : > { %2309 = vmatpush3.bf16.msra.mxu0 %v1439_v43  ;;  %v1053_v45 = vld [vmem:[#allocation3 + $0x8] sm:$0xf]  ;;  %2310 = vmatprep.mubr.msk.bf16.mxu0 %vm2908_vm0, %v2907_v0 }
 0x416   : > { %v1287_v47 = vsel %vm1063_vm3, %v1281_v44, 0.0  ;;  %v1393_v48 = vsel %vm1299_vm4, %v1053_v45, 0  ;;  %2320 = vmatprep.subr.bf16.mxu0 %v2907_v0 }
 0x417   : > { %v2525_v49 = vpop.eup %2524  ;;  %1288 = vadd.xlane.f32.xlu0 %v1287_v47  ;;  %2303 = vmatpush3.bf16.msra.mxu1 %v1393_v48 }
 0x418   : > { %v1282_v50 = vunpack.c.l.bf16 %v2525_v49  ;;  %2314 = vmatprep.subr.bf16.mxu1 %v2907_v0 }
 0x41a   : > { %2305 = vmatmul.mubr.msk.bf16.vlgmr.msra.gmra.mrb[20].mxu1 %vm1063_vm3, %v2525_v49  ;;  %v1290_v52 = vsel %vm1063_vm3, %v1282_v50, 0.0  ;;  %v2170_v50 = vld [vmem:[#allocation15] ss:$0 sm:$0xff] }
 0x41b   : > { %v2527_v53 = vpop.eup %2526  ;;  %1291 = vadd.xlane.f32.xlu0 %v1290_v52  ;;  %2315 = vmatpush3.bf16.msra.mxu1 %v1501_v51 }
 0x41c   : > { %2311 = vmatmul.mubr.msk.bf16.vlgmr.msra.gmra.mrb[16].mxu0 %vm1063_vm3, %v2527_v53  ;;  %v1283_v54 = vunpack.c.l.bf16 %v2527_v53  ;;  %2316 = vmatprep.mubr.msk.bf16.mxu1 %vm2908_vm0, %v2907_v0 }
 0x41d   : > { %2322 = vmatprep.mubr.msk.bf16.mxu0 %vm2908_vm0, %v2907_v0  ;;  %2326 = vmatprep.subr.bf16.mxu1 %v2907_v0 }
 0x41e   : > { %v1293_v55 = vsel %vm1063_vm3, %v1283_v54, 0.0  ;;  %2321 = vmatpush3.bf16.msra.mxu0 %v1547_v58 }
 0x41f   : > { %1294 = vadd.xlane.f32.xlu1 %v1293_v55  ;;  %2332 = vmatprep.subr.bf16.mxu0 %v2907_v0 }
 0x436   : > { %v1286_v56 = vpop.xlane.xlu1 %1285 }
 0x437   : > { %2528 = vrcp.f32 %v1286_v56 }
 0x441   : > { %v2529_v59 = vpop.eup %2528 }
 0x474   : > { %v1337_v60 = vpop.f32.mrb[16].mxu1 }
 0x475   : > { %v1485_v62 = vmul.f32 %v2529_v59, %v1337_v60  ;;  %v2294_v63 = vpop.f32.mrb[17].mxu1 }
 0x476   : > { %v1340_v1 = vpop.f32.mrb[18].mxu1 }
 0x477   : > { %v1489_v2 = vpack.c.bf16 %v1485_v62, %v1485_v62  ;;  %v2295_v3 = vpop.f32.mrb[19].mxu1  ;;  %v2514_v1 = vld [vmem:[%s3667_s6] sm:$0xff]  }
 0x479   : > { %2317 = vmatmul.mubr.msk.bf16.vlgmr.msra.gmra.mrb[24].mxu1 %vm1063_vm3, %v1489_v2  ;;  %v2515_v2 = vld [vmem:[%s3667_s6 + $0x8] sm:$0xff]  }
 0x47a   : > { %2327 = vmatpush3.bf16.msra.mxu1 %v1593_v4  ;;  %2328 = vmatprep.mubr.msk.bf16.mxu1 %vm2908_vm0, %v2907_v0 }
 0x47b   : > { %2338 = vmatprep.subr.bf16.mxu1 %v2907_v0 }
 0x4a4   : > { %v1289_v5 = vpop.xlane.xlu0 %1288 }
 0x4a5   : > { %2530 = vrcp.f32 %v1289_v5 }
 0x4a8   : > { %v1292_v7 = vpop.xlane.xlu0 %1291 }
 0x4a9   : > { %2532 = vrcp.f32 %v1292_v7  ;;  %v2171_v7 = vld [vmem:[#allocation16] ss:$0 sm:$0xff] }
 0x4ac   : > { %v1295_v8 = vpop.xlane.xlu1 %1294 }
 0x4ad   : > { %2534 = vrcp.f32 %v1295_v8 }
 0x4af   : > { %v2531_v9 = vpop.eup %2530 }
 0x4b3   : > { %v2533_v18 = vpop.eup %2532 }
 0x4b7   : > { %v2535_v22 = vpop.eup %2534 }
 0x4e7   : > { %v1383_v10 = vpop.f32.mrb[12].mxu0 }
 0x4e8   : > { %v1486_v12 = vmul.f32 %v2531_v9, %v1383_v10  ;;  %v2300_v13 = vpop.f32.mrb[13].mxu0  ;;  %v2172_v9 = vld [vmem:[#allocation18] ss:$0 sm:$0xff] }
 0x4e9   : > { %v1386_v14 = vpop.f32.mrb[14].mxu0  ;;  %v2516_v13 = vld [vmem:[%s3668_s14] sm:$0xff]  }
 0x4ea   : > { %v1490_v15 = vpack.c.bf16 %v1486_v12, %v1486_v12  ;;  %v2301_v16 = vpop.f32.mrb[15].mxu0  ;;  %v2517_v14 = vld [vmem:[%s3668_s14 + $0x8] sm:$0xff]  }
 0x4eb   : > { %v2519_v16 = vld [vmem:[%s3668_s14 + $0x18] sm:$0xff]  }
 0x4ec   : > { %2323 = vmatmul.mubr.msk.bf16.vlgmr.msra.gmra.mrb[20].mxu0 %vm1063_vm3, %v1490_v15  ;;  %v2518_v15 = vld [vmem:[%s3668_s14 + $0x10] sm:$0xff]  }
 0x4ed   : > { %v1429_v19 = vpop.f32.mrb[20].mxu1  ;;  %2333 = vmatpush3.bf16.msra.mxu0 %v1639_v17  ;;  %2334 = vmatprep.mubr.msk.bf16.mxu0 %vm2908_vm0, %v2907_v0  ;;  %v2173_v17 = vld [vmem:[%s3669_s4] ss:$0 sm:$0xff]  ;;  %s3672_s4 = sld [smem:[#allocation43_spill]] }
 0x4ee   : > { %v1487_v20 = vmul.f32 %v2533_v18, %v1429_v19  ;;  %v2306_v21 = vpop.f32.mrb[21].mxu1  ;;  %2346 = vmatprep.subr.bf16.mxu0 %v2907_v0 }
 0x4ef   : > { %v1432_v23 = vpop.f32.mrb[22].mxu1  ;;  %v1475_v24 = vpop.f32.mrb[16].mxu0 }
 0x4f0   : > { %v1491_v25 = vpack.c.bf16 %v1487_v20, %v1487_v20  ;;  %v1488_v26 = vmul.f32 %v2535_v22, %v1475_v24  ;;  %v2307_v27 = vpop.f32.mrb[23].mxu1  ;;  %v2312_v28 = vpop.f32.mrb[17].mxu0 }
 0x4f1   : > { %v1478_v29 = vpop.f32.mrb[18].mxu0 }
 0x4f2   : > { %v1492_v30 = vpack.c.bf16 %v1488_v26, %v1488_v26  ;;  %v2313_v31 = vpop.f32.mrb[19].mxu0  ;;  %2329 = vmatmul.mubr.msk.bf16.vlgmr.msra.gmra.mrb[28].mxu1 %vm1063_vm3, %v1491_v25  ;;  %v2177_v29 = vld [vmem:[%s3670_s17] ss:$0 sm:$0xff]  ;;  %s1930_s17 = sshll.u32 %s776_s23, 4  ;;  %s3539_s17 = int_to_ptr.vmem [resolvable:$true] %s1930_s17 }
 0x4f3   : > { %2342 = vmatprep.mubr.msk.bf16.mxu1 %vm2908_vm0, %v2907_v0  ;;  %2339 = vmatpush3.bf16.msra.mxu1 %v2514_v1  ;;  %s2796_s27 = scalar_lea.vmem %s3539_s17, 128  ;;  %p2803_p7 = scmp.lt.s32.totalorder %s3539_s17, %s2801_s24 }
 0x4f4   : > { %2335 = vmatmul.mubr.msk.bf16.vlgmr.msra.gmra.mrb[24].mxu0 %vm1063_vm3, %v1492_v30  ;;  %2340 = vmatprep.subr.bf16.mxu1 %v2907_v0  ;;  %p2797_p9 = scmp.ne.s32.totalorder %s3539_s17, %s2796_s27 }
 0x4f5   : > { %2354 = vmatprep.mubr.msk.bf16.mxu0 %vm2908_vm0, %v2907_v0  ;;  %2347 = vmatpush3.bf16.msra.mxu0 %v2516_v13 }
 0x4f6   : > { %2348 = vmatprep.subr.bf16.mxu0 %v2907_v0  ;;  %p2798_p1 = pnand %p2797_p9, %p3674_p10 }
 0x4f7   : > { %2341 = vmatpush3.bf16.msra.mxu1 %v2515_v2 }
 0x4f8   : > { %p2799_p0 = pneg %p2798_p1 }
 0x4f9   : > { %2349 = vmatpush3.bf16.msra.mxu0 %v2517_v14 }
 0x4fa   : > { %2350 = vmatprep.subr.bf16.mxu0 %v2907_v0 }
 0x4fd   : > { %2351 = vmatpush3.bf16.msra.mxu0 %v2518_v15 }
 0x4fe   : > { %2352 = vmatprep.subr.bf16.mxu0 %v2907_v0 }
 0x501   : > { %2353 = vmatpush3.bf16.msra.mxu0 %v2519_v16 }
 0x54c   : > { %v1537_v32 = vpop.f32.mrb[24].mxu1 }
 0x54d   : > { %v2318_v33 = vpop.f32.mrb[25].mxu1  ;;  %v1681_v37 = vsel %vm821_vm1, %v1537_v32, 0.0 }
 0x54e   : > { %v1540_v34 = vpop.f32.mrb[26].mxu1 }
 0x54f   : > { %v2319_v35 = vpop.f32.mrb[27].mxu1 }
 0x5bf   : > { %v1583_v36 = vpop.f32.mrb[20].mxu0 }
 0x5c0   : > { %v1682_v38 = vsel %vm821_vm1, %v1583_v36, 0.0  ;;  %v2324_v39 = vpop.f32.mrb[21].mxu0 }
 0x5c1   : > { %v1683_v40 = vadd.f32 %v1682_v38, %v1681_v37  ;;  %v1586_v41 = vpop.f32.mrb[22].mxu0 }
 0x5c2   : > { %v2325_v42 = vpop.f32.mrb[23].mxu0 }
 0x5c5   : > { %v1629_v43 = vpop.f32.mrb[28].mxu1 }
 0x5c6   : > { %v1684_v44 = vsel %vm821_vm1, %v1629_v43, 0.0  ;;  %v2330_v45 = vpop.f32.mrb[29].mxu1 }
 0x5c7   : > { %v1685_v46 = vadd.f32 %v1684_v44, %v1683_v40  ;;  %v1632_v47 = vpop.f32.mrb[30].mxu1  ;;  %v1675_v48 = vpop.f32.mrb[24].mxu0 }
 0x5c8   : > { %v1686_v49 = vsel %vm821_vm1, %v1675_v48, 0.0  ;;  %v2331_v51 = vpop.f32.mrb[31].mxu1  ;;  %v2336_v52 = vpop.f32.mrb[25].mxu0  ;;  %v2184_v48 = vld [vmem:[%s3672_s4] ss:$0 sm:$0xff] }
 0x5c9   : > { %v1687_v53 = vadd.f32 %v1686_v49, %v1685_v46  ;;  %v1678_v54 = vpop.f32.mrb[26].mxu0  ;;  %v2183_v46 = vld [vmem:[%s3671_s21] ss:$0 sm:$0xff]  ;;  %s2802_s21 = scalar_lea.vmem %s2801_s24, 256 }
 0x5ca   : > { %v2337_v55 = vpop.f32.mrb[27].mxu0  ;;  %p2804_p5 = scmp.lt.s32.totalorder %s2802_s21, %s2796_s27 }
 0x5cb   : > { %v1695_v56 = vadd.f32 %v2170_v50, %v1687_v53 }
 0x5cc   : > { %p2805_p8 = por %p2804_p5, %p2803_p7 }
 0x5cd   : > { %v1696_v57 = vadd.f32 %v1695_v56, %v3362_v6 }
 0x5ce   : > { %p2806_p3 = pnand %p2805_p8, %p2799_p0 }
 0x5cf   : > { %v1697_v58 = vsel %vm821_vm1, %v1696_v57, 0.0 }
 0x5d0   : > { %1698 = vadd.xlane.f32.xlu0 %v1697_v58 }
 0x65d   : > { %v1699_v59 = vpop.xlane.xlu0 %1698 }
 0x65e   : > { %v1701_v60 = vmul.f32 0.03125, %v1699_v59 }
 0x660   : > { %v1702_v61 = vsub.f32 %v1696_v57, %v1701_v60 }
 0x662   : > { %v1703_v62 = vmul.f32 %v1702_v61, %v1702_v61 }
 0x664   : > { %v1704_v63 = vsel %vm821_vm1, %v1703_v62, 0.0 }
 0x665   : > { %1705 = vadd.xlane.f32.xlu1 %v1704_v63 }
 0x6f2   : > { %v1706_v6 = vpop.xlane.xlu1 %1705 }
 0x6f3   : > { %v1707_v3 = vmul.f32 0.03125, %v1706_v6 }
 0x6f5   : > { %v1708_v4 = vadd.f32 1e-05, %v1707_v3 }
 0x6f7   : > { %2536 = vrsqrt.f32 %v1708_v4 }
 0x701   : > { %v2537_v5 = vpop.eup %2536 }
 0x702   : > { %v1710_v8 = vmul.f32 %v2537_v5, %v1702_v61 }
 0x704   : > { %v1718_v10 = vmul.f32 %v2171_v7, %v1710_v8 }
 0x706   : > { %v1726_v11 = vadd.f32 %v2172_v9, %v1718_v10 }
 0x708   : > { %v1727_v12 = vpack.c.bf16 %v1726_v11, %v1726_v11 }
 0x70a   : > { %2343 = vmatmul.mubr.msk.bf16.vlgmr.msra.gmra.mrb[32].mxu1 %vm821_vm1, %v1727_v12 }
 0x7dd   : > { %v1788_v18 = vpop.f32.mrb[32].mxu1 }
 0x7de   : > { %v1789_v19 = vadd.f32 %v2173_v17, %v1788_v18  ;;  %v2344_v20 = vpop.f32.mrb[33].mxu1 }
 0x7df   : > { %v1791_v21 = vpop.f32.mrb[34].mxu1 }
 0x7e0   : > { %v1794_v22 = vmul.f32 0.70710677, %v1789_v19  ;;  %v2345_v23 = vpop.f32.mrb[35].mxu1  ;;  %v1797_v24 = vpack.c.bf16 %v1789_v19, %v1789_v19 }
 0x7e2   : > { %2538 = verf.f32 %v1794_v22  ;;  %v1798_v0 = vmul.bf16 1056980736, %v1797_v24 }
 0x7ec   : > { %v2539_v25 = vpop.eup %2538 }
 0x7ed   : > { %v1796_v26 = vpack.c.bf16 %v2539_v25, %v2539_v25 }
 0x7ef   : > { %v1799_v27 = vadd.bf16 1065369472, %v1796_v26 }
 0x7f1   : > { %v1800_v28 = vmul.bf16 %v1799_v27, %v1798_v0 }
 0x7f3   : > { %2355 = vmatmul.mubr.msk.bf16.vlgmr.msra.gmra.mrb[28].mxu0 %vm1840_vm5, %v1800_v28 }
 0x8c6   : > { %v1878_v30 = vpop.f32.mrb[28].mxu0 }
 0x8c7   : > { %v1879_v31 = vadd.f32 %v2177_v29, %v1878_v30  ;;  %v2356_v32 = vpop.f32.mrb[29].mxu0 }
 0x8c8   : > { %v1881_v33 = vpop.f32.mrb[30].mxu0 }
 0x8c9   : > { %v2357_v34 = vpop.f32.mrb[31].mxu0  ;;  %v1884_v35 = vadd.f32 %v1879_v31, %v1726_v11 }
 0x8cb   : > { %v1885_v36 = vsel %vm821_vm1, %v1884_v35, 0.0 }
 0x8cc   : > { %1886 = vadd.xlane.f32.xlu0 %v1885_v36 }
 0x959   : > { %v1887_v37 = vpop.xlane.xlu0 %1886 }
 0x95a   : > { %v1888_v38 = vmul.f32 0.03125, %v1887_v37 }
 0x95c   : > { %v1889_v39 = vsub.f32 %v1884_v35, %v1888_v38 }
 0x95e   : > { %v1890_v40 = vmul.f32 %v1889_v39, %v1889_v39 }
 0x960   : > { %v1891_v41 = vsel %vm821_vm1, %v1890_v40, 0.0 }
 0x961   : > { %1892 = vadd.xlane.f32.xlu1 %v1891_v41 }
 0x9ee   : > { %v1893_v42 = vpop.xlane.xlu1 %1892 }
 0x9ef   : > { %v1894_v43 = vmul.f32 0.03125, %v1893_v42 }
 0x9f1   : > { %v1895_v44 = vadd.f32 1e-05, %v1894_v43 }
 0x9f3   : > { %2540 = vrsqrt.f32 %v1895_v44 }
 0x9fd   : > { %v2541_v45 = vpop.eup %2540 }
 0x9fe   : > { %v1897_v47 = vmul.f32 %v2541_v45, %v1889_v39 }
 0xa00   : > { %v1905_v49 = vmul.f32 %v2183_v46, %v1897_v47 }
 0xa02   : > { %v1913_v50 = vadd.f32 %v2184_v48, %v1905_v49 }
 0xa04   : > { %1914 = vst.msk [vmem:[%s776_s23] sm:$0xff] %vm821_vm1, %v1913_v50 }
 0xa05   : > { %2809 = shalt.err (!%p2806_p3)
}
 0xa06   : > { %s2810_s7 = scalar_lea.hbm %s3537_s10, 128  ;;  %s2814_s9 = scalar_lea.hbm %s3673_s8, 256 }
 0xa07   : > { %p2811_p11 = scmp.ne.s32.totalorder %s3537_s10, %s2810_s7  ;;  %p2815_p12 = scmp.lt.u32.totalorder %s3537_s10, %s3673_s8 }
 0xa08   : > { %p2816_p4 = scmp.lt.u32.totalorder %s2814_s9, %s2810_s7  ;;  %p2818_p9 = scmp.lt.u32.totalorder %s2810_s7, %s3537_s10 }
 0xa09   : > { %p2812_p6 = pnand %p2811_p11, %p3674_p10 }
 0xa0a   : > { %p2817_p2 = por %p2816_p4, %p2815_p12 }
 0xa0b   : > { %p2813_p13 = pneg %p2812_p6 }
 0xa0c   : > { %p2819_p1 = por %p2818_p9, %p2817_p2 }
 0xa0e   : > { %p2820_p0 = pnand %p2819_p1, %p2813_p13 }
 0xa10   : > { %2823 = shalt.err (!%p2820_p0)
}
 0xa11   : > { %2392 = dma.vmem_to_hbm [thread:$0]  (%p3674_p10), %s3539_s17, 128, %s3537_s10, %s1916_s26  }
 0xa12 PF: > { %s1942_s2 = sand.u32 1, %s2874_s0   ;;  %p3675_p7 = scmp.ne.s32.totalorder %s3657_s3, 0 }
 0xa13   : > { %p3676_p5 = scmp.ge.s32.totalorder %s2894_s22, 2  ;;  %s1943_s23 = scalar_lea.sflag [#allocation6], %s1942_s2 }
 0xa15   : > { %p2424_p8 = pnand %p3676_p5, %p3675_p7 }
 0xa17   : > { %2869 = dma.done.wait (!%p2424_p8), %s1943_s23, 128  }
 0xa18   : > { %2871 = vsyncadd (!%p2424_p8), %s1943_s23, 4294967168  ;;  %s39_s22 = sadd.s32 1, %s2894_s22   ;;  %s3677_s0 = smov %s2878_s30 }
 0xa19   : > { %p36_p3 = scmp.ge.s32.totalorder %s39_s22, 4   ;;  %s3678_s30 = smov %s2882_s20 }
 0xa1a   : > { %s3679_s20 = smov %s3271_s29  ;;  %s3680_s21 = smov %s2890_s1 }
 0xa1b   : > { %s3681_s1 = smov %s3683_s19  ;;  %38 = sbr.rel (!%p36_p3) target bundleno = 29 (0x1d), region = 189 }
 0xa22   :  { %1948 = vsyncpa [#allocation5], 1 }
 0xa23   :  { %1950 = vsyncpa [#allocation5 + $0x1], 1 }
 0xa24   :  { %1951 = vsyncpa [#allocation8], 1 }
 0xa25   :  { %1952 = vsyncpa [#allocation11], 1 }
 0xa26   :  { %1953 = vsyncpa [#allocation14], 1 }
 0xa27   :  { %1954 = vsyncpa [#allocation17], 1 }
 0xa28   :  { %1955 = vsyncpa [#allocation6], 1 }
 0xa29   :  { %1957 = vsyncpa [#allocation6 + $0x1], 1 }

</bundles_post_ra>
